<compile_context>
chip_gen: v7x
topology: tpu7x:2x2x1
jax: 0.10.0
libtpu: 0.0.40
codegen_flags: <defaults>
</compile_context>

<pallas_src>
import functools

import jax
import jax.numpy as jnp
from jax import lax
from jax.experimental import pallas as pl
from jax.experimental.pallas import tpu as pltpu

EPS = 1e-6                     # LayerNormalization eps (torch-tutorial: added to std)
NEG_BIG = 1e9                  # masked_fill magnitude
VMEM_LIMIT_BYTES = 64 * 1024 * 1024   # explicit scoped-VMEM budget (v7x physical = 64 MiB)


# ------------------------------ helpers ------------------------------------ #

def _pick_seq_tile(S, target=256, granule=16):
    """Largest multiple-of-`granule` divisor of S that is <= target (full S when small).
    granule=16 keeps bf16 sublane packing dense."""
    if S <= target:
        return S
    t = target - (target % granule)
    while t >= granule:
        if S % t == 0:
            return t
        t -= granule
    # TODO(synk): pad S (or use a masked ragged last tile) when S has no aligned
    # divisor; falling back to one full-S tile can blow VMEM for large prime-ish S.
    return S


def _layernorm_f32(x, alpha, beta):
    """torch-tutorial LayerNormalization: alpha*(x-mean)/(std+eps)+beta, unbiased std.
    Exact divide here (approx reciprocal is reserved for the softmax denominator)."""
    D = x.shape[-1]
    mean = jnp.mean(x, axis=-1, keepdims=True)
    d = x - mean
    var = jnp.sum(d * d, axis=-1, keepdims=True) * (1.0 / (D - 1))
    return alpha * (d / (jnp.sqrt(var) + EPS)) + beta


def prepare_params(params, num_heads, compute_dtype=jnp.bfloat16):
    """One-time (outside jit) parameter prep: fold 1/sqrt(dk) into Wq/bq, fuse QKV
    weights into a single [D,3D] matmul operand, and pre-cast weights to bf16 so the
    kernels never cast f32 weights in-VMEM (halves weight DMA + VMEM)."""
    D = params["wq"].shape[0]
    dk = D // num_heads
    scale = 1.0 / float(dk) ** 0.5
    wqkv = jnp.concatenate([params["wq"] * scale, params["wk"], params["wv"]], axis=1)
    bqkv = jnp.concatenate([params["bq"] * scale, params["bk"], params["bv"]], axis=1)
    cd = compute_dtype
    return {
        "ln1_a": params["ln1_a"].astype(jnp.float32),
        "ln1_b": params["ln1_b"].astype(jnp.float32),
        "ln2_a": params["ln2_a"].astype(jnp.float32),
        "ln2_b": params["ln2_b"].astype(jnp.float32),
        "wqkv": wqkv.astype(cd), "bqkv": bqkv.astype(cd),
        "wo": params["wo"].astype(cd), "bo": params["bo"].astype(cd),
        "w1": params["w1"].astype(cd), "b1": params["b1"].astype(cd),
        "w2": params["w2"].astype(cd), "b2": params["b2"].astype(cd),
    }


# ------------------------------ kernels ------------------------------------ #

def _ln_qkv_kernel(x_ref, la_ref, lb_ref, w_ref, wb_ref, q_ref, k_ref, v_ref,
                   *, compute_dtype):
    """LN1 followed by the fused QKV projection (one matmul against [D, 3D]).
    q/k/v are written in compute_dtype (bf16) to halve the inter-kernel HBM traffic."""
    D = x_ref.shape[-1]
    x = x_ref[...].astype(jnp.float32)
    h = _layernorm_f32(x, la_ref[...].astype(jnp.float32),
                       lb_ref[...].astype(jnp.float32))
    y = jnp.dot(h.astype(compute_dtype), w_ref[...],
                preferred_element_type=jnp.float32)
    y = (y + wb_ref[...].astype(jnp.float32)).astype(q_ref.dtype)   # (TS, 3D)
    q_ref[...] = y[:, :D]
    k_ref[...] = y[:, D:2 * D]
    v_ref[...] = y[:, 2 * D:3 * D]


def _attn_ffn_kernel(q_ref, k_ref, v_ref, bias_ref, wo_ref, bo_ref,
                     la2_ref, lb2_ref, w1_ref, b1_ref, w2_ref, b2_ref,
                     r_ref, o_ref, *, num_heads, compute_dtype):
    """Fused: all-heads attention for one (batch, q-tile) + output projection +
    residual + LN2 + FFN + residual.  No [B,S,D] intermediate ever hits HBM."""
    TQ, D = q_ref.shape
    H = num_heads
    dk = D // H

    q = q_ref[...]            # (TQ, D) compute_dtype, already scaled by 1/sqrt(dk)
    k = k_ref[...]            # (S,  D) -- VMEM-resident across all q-tiles of this batch
    v = v_ref[...]            # (S,  D)
    bias = bias_ref[...].astype(jnp.float32)    # (TQ, S) additive mask bias (0 / -1e9)

    dn_qk = (((1,), (1,)), ((), ()))   # q @ k^T without materializing a transpose
    ctxs = []
    # TODO(synk): for large H replace the static unroll with lax.fori_loop writing
    # into a VMEM scratch to bound vreg live ranges; H<=8 unrolls fine.
    for h in range(H):
        lo = h * dk
        qh = q[:, lo:lo + dk]
        kh = k[:, lo:lo + dk]
        vh = v[:, lo:lo + dk]

        s = lax.dot_general(qh, kh, dn_qk, preferred_element_type=jnp.float32)
        s = s + bias
        s = s - jnp.max(s, axis=-1, keepdims=True)
        # bf16 exp relieves the EUP (binding slot for small dk on v6e/v7x); sum stays f32.
        e = jnp.exp(s.astype(compute_dtype)).astype(jnp.float32)
        p = e * pl.reciprocal(jnp.sum(e, axis=-1, keepdims=True), approx=True)
        # TODO(synk): attention dropout is identity in eval mode (not implemented).
        ctx = jnp.dot(p.astype(compute_dtype), vh, preferred_element_type=jnp.float32)
        ctxs.append(ctx.astype(compute_dtype))

    # One full-D contraction for the output projection (MXU-efficient on v6e/v7x).
    ctx_all = jnp.concatenate(ctxs, axis=-1)                         # (TQ, D)
    attn = jnp.dot(ctx_all, wo_ref[...], preferred_element_type=jnp.float32)
    x1 = attn + bo_ref[...].astype(jnp.float32) + r_ref[...].astype(jnp.float32)

    # LN2 + FFN (Linear -> ReLU -> Linear) + residual.
    h2 = _layernorm_f32(x1, la2_ref[...].astype(jnp.float32),
                        lb2_ref[...].astype(jnp.float32))
    t = jnp.dot(h2.astype(compute_dtype), w1_ref[...], preferred_element_type=jnp.float32)
    t = jnp.maximum(t + b1_ref[...].astype(jnp.float32), 0.0)
    y = jnp.dot(t.astype(compute_dtype), w2_ref[...], preferred_element_type=jnp.float32)
    y = y + b2_ref[...].astype(jnp.float32)
    # TODO(synk): FFN / residual dropout is identity in eval mode.
    o_ref[...] = (x1 + y).astype(o_ref.dtype)


# --------------------------- EncoderBlock forward --------------------------- #

@functools.partial(jax.jit, static_argnames=("num_heads", "compute_dtype"))
def encoder_block(x, src_mask, params, num_heads, compute_dtype=jnp.bfloat16):
    """x: [B,S,D]; src_mask: [B,1,S,S] with 1=keep, 0=masked. `params` must come from
    prepare_params() (fused QKV, scale folded into Wq, weights pre-cast to bf16)."""
    B, S, D = x.shape
    Dff = params["w1"].shape[1]
    ts = _pick_seq_tile(S)
    nst = S // ts

    cparams = pltpu.CompilerParams(
        dimension_semantics=("parallel", "parallel"),
        vmem_limit_bytes=VMEM_LIMIT_BYTES,
    )
    ONE_BUF = pl.Buffered(1)   # single-buffer constant operands (halves their VMEM)

    # Additive mask bias precomputed once per call (and in compute_dtype: halves the
    # per-grid-step (ts,S) mask DMA): 0 where keep, -1e9 where masked.
    bias = ((src_mask.astype(jnp.float32) - 1.0) * NEG_BIG).astype(compute_dtype)

    # --- kernel 1: LN1 + fused QKV projection -------------------------------- #
    q, k, v = pl.pallas_call(
        functools.partial(_ln_qkv_kernel, compute_dtype=compute_dtype),
        out_shape=(jax.ShapeDtypeStruct((B, S, D), compute_dtype),
                   jax.ShapeDtypeStruct((B, S, D), compute_dtype),
                   jax.ShapeDtypeStruct((B, S, D), compute_dtype)),
        grid=(B, nst),
        in_specs=[
            pl.BlockSpec((None, ts, D), lambda b, i: (b, i, 0)),
            pl.BlockSpec((1, D), lambda b, i: (0, 0), pipeline_mode=ONE_BUF),
            pl.BlockSpec((1, D), lambda b, i: (0, 0), pipeline_mode=ONE_BUF),
            pl.BlockSpec((D, 3 * D), lambda b, i: (0, 0), pipeline_mode=ONE_BUF),
            pl.BlockSpec((1, 3 * D), lambda b, i: (0, 0), pipeline_mode=ONE_BUF),
        ],
        out_specs=(pl.BlockSpec((None, ts, D), lambda b, i: (b, i, 0)),
                   pl.BlockSpec((None, ts, D), lambda b, i: (b, i, 0)),
                   pl.BlockSpec((None, ts, D), lambda b, i: (b, i, 0))),
        compiler_params=cparams,
    )(x, params["ln1_a"], params["ln1_b"], params["wqkv"], params["bqkv"])

    # --- kernel 2: attention + out-proj + residual + LN2 + FFN + residual ----- #
    # K/V stay full-S VMEM-resident per batch (bf16).
    # TODO(synk): for very long S on v7x, tile K/V over a third grid axis with an
    # online-softmax running max/sum instead of full-S residency.
    out = pl.pallas_call(
        functools.partial(_attn_ffn_kernel, num_heads=num_heads,
                          compute_dtype=compute_dtype),
        out_shape=jax.ShapeDtypeStruct((B, S, D), x.dtype),
        grid=(B, nst),
        in_specs=[
            pl.BlockSpec((None, ts, D), lambda b, i: (b, i, 0)),                 # q tile
            pl.BlockSpec((None, S, D), lambda b, i: (b, 0, 0)),                  # full K
            pl.BlockSpec((None, S, D), lambda b, i: (b, 0, 0)),                  # full V
            pl.BlockSpec((None, None, ts, S), lambda b, i: (b, 0, i, 0)),        # mask bias
            pl.BlockSpec((D, D), lambda b, i: (0, 0), pipeline_mode=ONE_BUF),    # Wo
            pl.BlockSpec((1, D), lambda b, i: (0, 0), pipeline_mode=ONE_BUF),    # bo
            pl.BlockSpec((1, D), lambda b, i: (0, 0), pipeline_mode=ONE_BUF),    # ln2_a
            pl.BlockSpec((1, D), lambda b, i: (0, 0), pipeline_mode=ONE_BUF),    # ln2_b
            pl.BlockSpec((D, Dff), lambda b, i: (0, 0), pipeline_mode=ONE_BUF),  # W1
            pl.BlockSpec((1, Dff), lambda b, i: (0, 0), pipeline_mode=ONE_BUF),  # b1
            pl.BlockSpec((Dff, D), lambda b, i: (0, 0), pipeline_mode=ONE_BUF),  # W2
            pl.BlockSpec((1, D), lambda b, i: (0, 0), pipeline_mode=ONE_BUF),    # b2
            pl.BlockSpec((None, ts, D), lambda b, i: (b, i, 0)),                 # residual x
        ],
        out_specs=pl.BlockSpec((None, ts, D), lambda b, i: (b, i, 0)),
        # Residual buffer aliased to the output (for true in-place, donate x at jit).
        input_output_aliases={12: 0},
        compiler_params=cparams,
    )(q, k, v, bias, params["wo"], params["bo"], params["ln2_a"], params["ln2_b"],
      params["w1"], params["b1"], params["w2"], params["b2"], x)
    return out


# ------------------------------- reference ---------------------------------- #

def _reference(x, src_mask, p, H):
    def ln(t, a, b):
        mean = t.mean(-1, keepdims=True)
        d = t - mean
        std = jnp.sqrt((d * d).sum(-1, keepdims=True) / (t.shape[-1] - 1))
        return a * d / (std + EPS) + b

    B, S, D = x.shape
    dk = D // H
    h = ln(x, p["ln1_a"], p["ln1_b"])
    q = (h @ p["wq"] + p["bq"]).reshape(B, S, H, dk).transpose(0, 2, 1, 3)
    k = (h @ p["wk"] + p["bk"]).reshape(B, S, H, dk).transpose(0, 2, 1, 3)
    v = (h @ p["wv"] + p["bv"]).reshape(B, S, H, dk).transpose(0, 2, 1, 3)
    s = jnp.einsum("bhqd,bhkd->bhqk", q, k) / jnp.sqrt(jnp.float32(dk))
    s = jnp.where(src_mask == 0, -NEG_BIG, s)
    a = jnp.einsum("bhqk,bhkd->bhqd", jax.nn.softmax(s, axis=-1), v)
    a = a.transpose(0, 2, 1, 3).reshape(B, S, D)
    x = x + (a @ p["wo"] + p["bo"])
    h2 = ln(x, p["ln2_a"], p["ln2_b"])
    y = jnp.maximum(h2 @ p["w1"] + p["b1"], 0.0) @ p["w2"] + p["b2"]
    return x + y


# ---------------------------------- main ------------------------------------- #

if __name__ == "__main__":
    B, S, D, H, Dff = 2, 8, 32, 4, 64

    key = jax.random.PRNGKey(0)
    ks = jax.random.split(key, 14)

    def w(k, shape, scale=0.05):
        return (scale * jax.random.normal(k, shape)).astype(jnp.float32)

    params_f32 = {
        "ln1_a": jnp.ones((1, D), jnp.float32), "ln1_b": jnp.zeros((1, D), jnp.float32),
        "ln2_a": jnp.ones((1, D), jnp.float32), "ln2_b": jnp.zeros((1, D), jnp.float32),
        "wq": w(ks[0], (D, D)), "bq": w(ks[1], (1, D)),
        "wk": w(ks[2], (D, D)), "bk": w(ks[3], (1, D)),
        "wv": w(ks[4], (D, D)), "bv": w(ks[5], (1, D)),
        "wo": w(ks[6], (D, D)), "bo": w(ks[7], (1, D)),
        "w1": w(ks[8], (D, Dff)), "b1": w(ks[9], (1, Dff)),
        "w2": w(ks[10], (Dff, D)), "b2": w(ks[11], (1, D)),
    }

    x = jax.random.normal(ks[12], (B, S, D), jnp.float32)
    # src_mask: 1 = attend, 0 = masked; mask out the last 2 key positions of batch 1.
    src_mask = jnp.ones((B, 1, S, S), jnp.float32)
    src_mask = src_mask.at[1, :, :, S - 2:].set(0.0)

    ref = _reference(x, src_mask, params_f32, H)

    # One-time parameter prep (fused QKV, folded scale, bf16 weights) outside jit.
    params = prepare_params(params_f32, num_heads=H, compute_dtype=jnp.bfloat16)

    out = encoder_block(x, src_mask, params, num_heads=H)
    out = jax.block_until_ready(out)

    assert out.shape == (B, S, D) and out.dtype == jnp.float32
    # Tolerance covers bf16 MXU compute + the approx softmax reciprocal.
    assert bool(jnp.allclose(out, ref, rtol=2e-2, atol=2e-2)), "mismatch vs reference"

    print("KERNEL_OK")
</pallas_src>

<mosaic_0001>
module attributes {stable_mosaic.version = 11 : i64} {
  func.func @_ln_qkv_kernel(%arg0: i32, %arg1: i32, %arg2: memref<1x8x32xf32, #tpu.memory_space<vmem>>, %arg3: memref<1x32xf32, #tpu.memory_space<vmem>>, %arg4: memref<1x32xf32, #tpu.memory_space<vmem>>, %arg5: memref<32x96xbf16, #tpu.memory_space<vmem>>, %arg6: memref<1x96xbf16, #tpu.memory_space<vmem>>, %arg7: memref<1x8x32xbf16, #tpu.memory_space<vmem>>, %arg8: memref<1x8x32xbf16, #tpu.memory_space<vmem>>, %arg9: memref<1x8x32xbf16, #tpu.memory_space<vmem>>) attributes {dimension_semantics = [#tpu.dimension_semantics<parallel>, #tpu.dimension_semantics<parallel>], iteration_bounds = array<i64: 2, 1>, scalar_prefetch = 0 : i64, scratch_operands = 0 : i64, tpu.core_type = #tpu.core_type<tc>, window_params = [{transform_indices = @transform_0, window_bounds = array<i64: 1, 8, 32>}, {pipeline_mode = #tpu.pipeline_mode<synchronous>, transform_indices = @transform_1, window_bounds = array<i64: 1, 32>}, {pipeline_mode = #tpu.pipeline_mode<synchronous>, transform_indices = @transform_2, window_bounds = array<i64: 1, 32>}, {pipeline_mode = #tpu.pipeline_mode<synchronous>, transform_indices = @transform_3, window_bounds = array<i64: 32, 96>}, {pipeline_mode = #tpu.pipeline_mode<synchronous>, transform_indices = @transform_4, window_bounds = array<i64: 1, 96>}, {transform_indices = @transform_5, window_bounds = array<i64: 1, 8, 32>}, {transform_indices = @transform_6, window_bounds = array<i64: 1, 8, 32>}, {transform_indices = @transform_7, window_bounds = array<i64: 1, 8, 32>}]} {
    %c0 = arith.constant 0 : index
    %c0_0 = arith.constant 0 : index
    %c0_1 = arith.constant 0 : index
    %0 = vector.load %arg2[%c0, %c0_0, %c0_1] : memref<1x8x32xf32, #tpu.memory_space<vmem>>, vector<1x8x32xf32>
    %1 = vector.shape_cast %0 : vector<1x8x32xf32> to vector<8x32xf32>
    %c0_2 = arith.constant 0 : index
    %c0_3 = arith.constant 0 : index
    %2 = vector.load %arg3[%c0_2, %c0_3] : memref<1x32xf32, #tpu.memory_space<vmem>>, vector<1x32xf32>
    %c0_4 = arith.constant 0 : index
    %c0_5 = arith.constant 0 : index
    %3 = vector.load %arg4[%c0_4, %c0_5] : memref<1x32xf32, #tpu.memory_space<vmem>>, vector<1x32xf32>
    %cst = arith.constant dense<0.000000e+00> : vector<8xf32>
    %4 = vector.multi_reduction <add>, %1, %cst [1] : vector<8x32xf32> to vector<8xf32>
    %5 = vector.shape_cast %4 : vector<8xf32> to vector<8x1xf32>
    %cst_6 = arith.constant 3.200000e+01 : f32
    %6 = vector.broadcast %cst_6 : f32 to vector<8x1xf32>
    %7 = arith.divf %5, %6 : vector<8x1xf32>
    %8 = vector.broadcast %7 : vector<8x1xf32> to vector<8x32xf32>
    %9 = arith.subf %1, %8 : vector<8x32xf32>
    %10 = arith.mulf %9, %9 : vector<8x32xf32>
    %cst_7 = arith.constant dense<0.000000e+00> : vector<8xf32>
    %11 = vector.multi_reduction <add>, %10, %cst_7 [1] : vector<8x32xf32> to vector<8xf32>
    %12 = vector.shape_cast %11 : vector<8xf32> to vector<8x1xf32>
    %cst_8 = arith.constant 0.0322580636 : f32
    %13 = vector.broadcast %cst_8 : f32 to vector<8x1xf32>
    %14 = arith.mulf %12, %13 : vector<8x1xf32>
    %15 = math.sqrt %14 : vector<8x1xf32>
    %cst_9 = arith.constant 9.99999997E-7 : f32
    %16 = vector.broadcast %cst_9 : f32 to vector<8x1xf32>
    %17 = arith.addf %15, %16 : vector<8x1xf32>
    %18 = vector.broadcast %17 : vector<8x1xf32> to vector<8x32xf32>
    %19 = arith.divf %9, %18 : vector<8x32xf32>
    %20 = vector.broadcast %2 : vector<1x32xf32> to vector<8x32xf32>
    %21 = arith.mulf %20, %19 : vector<8x32xf32>
    %22 = vector.broadcast %3 : vector<1x32xf32> to vector<8x32xf32>
    %23 = arith.addf %21, %22 : vector<8x32xf32>
    %24 = arith.truncf %23 : vector<8x32xf32> to vector<8x32xbf16>
    %c0_10 = arith.constant 0 : index
    %c0_11 = arith.constant 0 : index
    %25 = vector.load %arg5[%c0_10, %c0_11] : memref<32x96xbf16, #tpu.memory_space<vmem>>, vector<32x96xbf16>
    %cst_12 = arith.constant dense<0.000000e+00> : vector<8x96xf32>
    %26 = tpu.matmul %24, %25, %cst_12 {dimension_numbers = #tpu.dot_dimension_numbers<[1], [0], [0], [1], [0, 0, 1, 1], [], []>} : vector<8x32xbf16>, vector<32x96xbf16>, vector<8x96xf32> -> vector<8x96xf32>
    %c0_13 = arith.constant 0 : index
    %c0_14 = arith.constant 0 : index
    %27 = vector.load %arg6[%c0_13, %c0_14] : memref<1x96xbf16, #tpu.memory_space<vmem>>, vector<1x96xbf16>
    %28 = arith.extf %27 : vector<1x96xbf16> to vector<1x96xf32>
    %29 = vector.broadcast %28 : vector<1x96xf32> to vector<8x96xf32>
    %30 = arith.addf %26, %29 : vector<8x96xf32>
    %31 = arith.truncf %30 : vector<8x96xf32> to vector<8x96xbf16>
    %32 = vector.extract_strided_slice %31 {offsets = [0, 0], sizes = [8, 32], strides = [1, 1]} : vector<8x96xbf16> to vector<8x32xbf16>
    %c0_15 = arith.constant 0 : index
    %c0_16 = arith.constant 0 : index
    %c0_17 = arith.constant 0 : index
    %33 = vector.load %arg7[%c0_15, %c0_16, %c0_17] : memref<1x8x32xbf16, #tpu.memory_space<vmem>>, vector<1x8x32xbf16>
    %34 = vector.shape_cast %33 : vector<1x8x32xbf16> to vector<8x32xbf16>
    %35 = vector.shape_cast %32 : vector<8x32xbf16> to vector<1x8x32xbf16>
    tpu.vector_store %arg7[%c0_15, %c0_16, %c0_17], %35 {strides = array<i32>} : memref<1x8x32xbf16, #tpu.memory_space<vmem>>, vector<1x8x32xbf16>,
    %36 = vector.extract_strided_slice %31 {offsets = [0, 32], sizes = [8, 32], strides = [1, 1]} : vector<8x96xbf16> to vector<8x32xbf16>
    %c0_18 = arith.constant 0 : index
    %c0_19 = arith.constant 0 : index
    %c0_20 = arith.constant 0 : index
    %37 = vector.load %arg8[%c0_18, %c0_19, %c0_20] : memref<1x8x32xbf16, #tpu.memory_space<vmem>>, vector<1x8x32xbf16>
    %38 = vector.shape_cast %37 : vector<1x8x32xbf16> to vector<8x32xbf16>
    %39 = vector.shape_cast %36 : vector<8x32xbf16> to vector<1x8x32xbf16>
    tpu.vector_store %arg8[%c0_18, %c0_19, %c0_20], %39 {strides = array<i32>} : memref<1x8x32xbf16, #tpu.memory_space<vmem>>, vector<1x8x32xbf16>,
    %40 = vector.extract_strided_slice %31 {offsets = [0, 64], sizes = [8, 32], strides = [1, 1]} : vector<8x96xbf16> to vector<8x32xbf16>
    %c0_21 = arith.constant 0 : index
    %c0_22 = arith.constant 0 : index
    %c0_23 = arith.constant 0 : index
    %41 = vector.load %arg9[%c0_21, %c0_22, %c0_23] : memref<1x8x32xbf16, #tpu.memory_space<vmem>>, vector<1x8x32xbf16>
    %42 = vector.shape_cast %41 : vector<1x8x32xbf16> to vector<8x32xbf16>
    %43 = vector.shape_cast %40 : vector<8x32xbf16> to vector<1x8x32xbf16>
    tpu.vector_store %arg9[%c0_21, %c0_22, %c0_23], %43 {strides = array<i32>} : memref<1x8x32xbf16, #tpu.memory_space<vmem>>, vector<1x8x32xbf16>,
    return
  }
  func.func @transform_0(%arg0: i32, %arg1: i32) -> (i32, i32, i32) {
    %c0_i32 = arith.constant 0 : i32
    %c0_i32_0 = arith.constant 0 : i32
    return %arg0, %arg1, %c0_i32 : i32, i32, i32
  }
  func.func @transform_1(%arg0: i32, %arg1: i32) -> (i32, i32) {
    %c0_i32 = arith.constant 0 : i32
    %c0_i32_0 = arith.constant 0 : i32
    %c0_i32_1 = arith.constant 0 : i32
    return %c0_i32, %c0_i32_0 : i32, i32
  }
  func.func @transform_2(%arg0: i32, %arg1: i32) -> (i32, i32) {
    %c0_i32 = arith.constant 0 : i32
    %c0_i32_0 = arith.constant 0 : i32
    %c0_i32_1 = arith.constant 0 : i32
    return %c0_i32, %c0_i32_0 : i32, i32
  }
  func.func @transform_3(%arg0: i32, %arg1: i32) -> (i32, i32) {
    %c0_i32 = arith.constant 0 : i32
    %c0_i32_0 = arith.constant 0 : i32
    %c0_i32_1 = arith.constant 0 : i32
    return %c0_i32, %c0_i32_0 : i32, i32
  }
  func.func @transform_4(%arg0: i32, %arg1: i32) -> (i32, i32) {
    %c0_i32 = arith.constant 0 : i32
    %c0_i32_0 = arith.constant 0 : i32
    %c0_i32_1 = arith.constant 0 : i32
    return %c0_i32, %c0_i32_0 : i32, i32
  }
  func.func @transform_5(%arg0: i32, %arg1: i32) -> (i32, i32, i32) {
    %c0_i32 = arith.constant 0 : i32
    %c0_i32_0 = arith.constant 0 : i32
    return %arg0, %arg1, %c0_i32 : i32, i32, i32
  }
  func.func @transform_6(%arg0: i32, %arg1: i32) -> (i32, i32, i32) {
    %c0_i32 = arith.constant 0 : i32
    %c0_i32_0 = arith.constant 0 : i32
    return %arg0, %arg1, %c0_i32 : i32, i32, i32
  }
  func.func @transform_7(%arg0: i32, %arg1: i32) -> (i32, i32, i32) {
    %c0_i32 = arith.constant 0 : i32
    %c0_i32_0 = arith.constant 0 : i32
    return %arg0, %arg1, %c0_i32 : i32, i32, i32
  }
}

module attributes {stable_mosaic.version = 11 : i64} {
  func.func @_attn_ffn_kernel(%arg0: i32, %arg1: i32, %arg2: memref<1x8x32xbf16, #tpu.memory_space<vmem>>, %arg3: memref<1x8x32xbf16, #tpu.memory_space<vmem>>, %arg4: memref<1x8x32xbf16, #tpu.memory_space<vmem>>, %arg5: memref<1x1x8x8xbf16, #tpu.memory_space<vmem>>, %arg6: memref<32x32xbf16, #tpu.memory_space<vmem>>, %arg7: memref<1x32xbf16, #tpu.memory_space<vmem>>, %arg8: memref<1x32xf32, #tpu.memory_space<vmem>>, %arg9: memref<1x32xf32, #tpu.memory_space<vmem>>, %arg10: memref<32x64xbf16, #tpu.memory_space<vmem>>, %arg11: memref<1x64xbf16, #tpu.memory_space<vmem>>, %arg12: memref<64x32xbf16, #tpu.memory_space<vmem>>, %arg13: memref<1x32xbf16, #tpu.memory_space<vmem>>, %arg14: memref<1x8x32xf32, #tpu.memory_space<vmem>>, %arg15: memref<1x8x32xf32, #tpu.memory_space<vmem>>) attributes {dimension_semantics = [#tpu.dimension_semantics<parallel>, #tpu.dimension_semantics<parallel>], iteration_bounds = array<i64: 2, 1>, scalar_prefetch = 0 : i64, scratch_operands = 0 : i64, tpu.core_type = #tpu.core_type<tc>, window_params = [{transform_indices = @transform_0, window_bounds = array<i64: 1, 8, 32>}, {transform_indices = @transform_1, window_bounds = array<i64: 1, 8, 32>}, {transform_indices = @transform_2, window_bounds = array<i64: 1, 8, 32>}, {transform_indices = @transform_3, window_bounds = array<i64: 1, 1, 8, 8>}, {pipeline_mode = #tpu.pipeline_mode<synchronous>, transform_indices = @transform_4, window_bounds = array<i64: 32, 32>}, {pipeline_mode = #tpu.pipeline_mode<synchronous>, transform_indices = @transform_5, window_bounds = array<i64: 1, 32>}, {pipeline_mode = #tpu.pipeline_mode<synchronous>, transform_indices = @transform_6, window_bounds = array<i64: 1, 32>}, {pipeline_mode = #tpu.pipeline_mode<synchronous>, transform_indices = @transform_7, window_bounds = array<i64: 1, 32>}, {pipeline_mode = #tpu.pipeline_mode<synchronous>, transform_indices = @transform_8, window_bounds = array<i64: 32, 64>}, {pipeline_mode = #tpu.pipeline_mode<synchronous>, transform_indices = @transform_9, window_bounds = array<i64: 1, 64>}, {pipeline_mode = #tpu.pipeline_mode<synchronous>, transform_indices = @transform_10, window_bounds = array<i64: 64, 32>}, {pipeline_mode = #tpu.pipeline_mode<synchronous>, transform_indices = @transform_11, window_bounds = array<i64: 1, 32>}, {transform_indices = @transform_12, window_bounds = array<i64: 1, 8, 32>}, {transform_indices = @transform_13, window_bounds = array<i64: 1, 8, 32>}]} {
    %c0 = arith.constant 0 : index
    %c0_0 = arith.constant 0 : index
    %c0_1 = arith.constant 0 : index
    %0 = vector.load %arg2[%c0, %c0_0, %c0_1] : memref<1x8x32xbf16, #tpu.memory_space<vmem>>, vector<1x8x32xbf16>
    %1 = vector.shape_cast %0 : vector<1x8x32xbf16> to vector<8x32xbf16>
    %c0_2 = arith.constant 0 : index
    %c0_3 = arith.constant 0 : index
    %c0_4 = arith.constant 0 : index
    %2 = vector.load %arg3[%c0_2, %c0_3, %c0_4] : memref<1x8x32xbf16, #tpu.memory_space<vmem>>, vector<1x8x32xbf16>
    %3 = vector.shape_cast %2 : vector<1x8x32xbf16> to vector<8x32xbf16>
    %c0_5 = arith.constant 0 : index
    %c0_6 = arith.constant 0 : index
    %c0_7 = arith.constant 0 : index
    %4 = vector.load %arg4[%c0_5, %c0_6, %c0_7] : memref<1x8x32xbf16, #tpu.memory_space<vmem>>, vector<1x8x32xbf16>
    %5 = vector.shape_cast %4 : vector<1x8x32xbf16> to vector<8x32xbf16>
    %c0_8 = arith.constant 0 : index
    %c0_9 = arith.constant 0 : index
    %c0_10 = arith.constant 0 : index
    %c0_11 = arith.constant 0 : index
    %6 = vector.load %arg5[%c0_8, %c0_9, %c0_10, %c0_11] : memref<1x1x8x8xbf16, #tpu.memory_space<vmem>>, vector<1x1x8x8xbf16>
    %7 = vector.shape_cast %6 : vector<1x1x8x8xbf16> to vector<8x8xbf16>
    %8 = arith.extf %7 : vector<8x8xbf16> to vector<8x8xf32>
    %9 = vector.extract_strided_slice %1 {offsets = [0, 0], sizes = [8, 8], strides = [1, 1]} : vector<8x32xbf16> to vector<8x8xbf16>
    %10 = vector.extract_strided_slice %3 {offsets = [0, 0], sizes = [8, 8], strides = [1, 1]} : vector<8x32xbf16> to vector<8x8xbf16>
    %11 = vector.extract_strided_slice %5 {offsets = [0, 0], sizes = [8, 8], strides = [1, 1]} : vector<8x32xbf16> to vector<8x8xbf16>
    %cst = arith.constant dense<0.000000e+00> : vector<8x8xf32>
    %12 = tpu.matmul %9, %10, %cst {dimension_numbers = #tpu.dot_dimension_numbers<[1], [1], [0], [0], [0, 0, 1, 0], [], []>} : vector<8x8xbf16>, vector<8x8xbf16>, vector<8x8xf32> -> vector<8x8xf32>
    %13 = arith.addf %12, %8 : vector<8x8xf32>
    %cst_12 = arith.constant dense<0xFF800000> : vector<8xf32>
    %14 = vector.multi_reduction <maximumf>, %13, %cst_12 [1] : vector<8x8xf32> to vector<8xf32>
    %15 = vector.shape_cast %14 : vector<8xf32> to vector<8x1xf32>
    %16 = vector.broadcast %15 : vector<8x1xf32> to vector<8x8xf32>
    %17 = arith.subf %13, %16 : vector<8x8xf32>
    %18 = arith.truncf %17 : vector<8x8xf32> to vector<8x8xbf16>
    %19 = math.exp %18 : vector<8x8xbf16>
    %20 = arith.extf %19 : vector<8x8xbf16> to vector<8x8xf32>
    %cst_13 = arith.constant dense<0.000000e+00> : vector<8xf32>
    %21 = vector.multi_reduction <add>, %20, %cst_13 [1] : vector<8x8xf32> to vector<8xf32>
    %22 = vector.shape_cast %21 : vector<8xf32> to vector<8x1xf32>
    %23 = tpu.reciprocal %22 {approx = true} : vector<8x1xf32> -> vector<8x1xf32>
    %24 = vector.broadcast %23 : vector<8x1xf32> to vector<8x8xf32>
    %25 = arith.mulf %20, %24 : vector<8x8xf32>
    %26 = arith.truncf %25 : vector<8x8xf32> to vector<8x8xbf16>
    %cst_14 = arith.constant dense<0.000000e+00> : vector<8x8xf32>
    %27 = tpu.matmul %26, %11, %cst_14 {dimension_numbers = #tpu.dot_dimension_numbers<[1], [0], [0], [1], [0, 0, 1, 1], [], []>} : vector<8x8xbf16>, vector<8x8xbf16>, vector<8x8xf32> -> vector<8x8xf32>
    %28 = arith.truncf %27 : vector<8x8xf32> to vector<8x8xbf16>
    %29 = vector.extract_strided_slice %1 {offsets = [0, 8], sizes = [8, 8], strides = [1, 1]} : vector<8x32xbf16> to vector<8x8xbf16>
    %30 = vector.extract_strided_slice %3 {offsets = [0, 8], sizes = [8, 8], strides = [1, 1]} : vector<8x32xbf16> to vector<8x8xbf16>
    %31 = vector.extract_strided_slice %5 {offsets = [0, 8], sizes = [8, 8], strides = [1, 1]} : vector<8x32xbf16> to vector<8x8xbf16>
    %cst_15 = arith.constant dense<0.000000e+00> : vector<8x8xf32>
    %32 = tpu.matmul %29, %30, %cst_15 {dimension_numbers = #tpu.dot_dimension_numbers<[1], [1], [0], [0], [0, 0, 1, 0], [], []>} : vector<8x8xbf16>, vector<8x8xbf16>, vector<8x8xf32> -> vector<8x8xf32>
    %33 = arith.addf %32, %8 : vector<8x8xf32>
    %cst_16 = arith.constant dense<0xFF800000> : vector<8xf32>
    %34 = vector.multi_reduction <maximumf>, %33, %cst_16 [1] : vector<8x8xf32> to vector<8xf32>
    %35 = vector.shape_cast %34 : vector<8xf32> to vector<8x1xf32>
    %36 = vector.broadcast %35 : vector<8x1xf32> to vector<8x8xf32>
    %37 = arith.subf %33, %36 : vector<8x8xf32>
    %38 = arith.truncf %37 : vector<8x8xf32> to vector<8x8xbf16>
    %39 = math.exp %38 : vector<8x8xbf16>
    %40 = arith.extf %39 : vector<8x8xbf16> to vector<8x8xf32>
    %cst_17 = arith.constant dense<0.000000e+00> : vector<8xf32>
    %41 = vector.multi_reduction <add>, %40, %cst_17 [1] : vector<8x8xf32> to vector<8xf32>
    %42 = vector.shape_cast %41 : vector<8xf32> to vector<8x1xf32>
    %43 = tpu.reciprocal %42 {approx = true} : vector<8x1xf32> -> vector<8x1xf32>
    %44 = vector.broadcast %43 : vector<8x1xf32> to vector<8x8xf32>
    %45 = arith.mulf %40, %44 : vector<8x8xf32>
    %46 = arith.truncf %45 : vector<8x8xf32> to vector<8x8xbf16>
    %cst_18 = arith.constant dense<0.000000e+00> : vector<8x8xf32>
    %47 = tpu.matmul %46, %31, %cst_18 {dimension_numbers = #tpu.dot_dimension_numbers<[1], [0], [0], [1], [0, 0, 1, 1], [], []>} : vector<8x8xbf16>, vector<8x8xbf16>, vector<8x8xf32> -> vector<8x8xf32>
    %48 = arith.truncf %47 : vector<8x8xf32> to vector<8x8xbf16>
    %49 = vector.extract_strided_slice %1 {offsets = [0, 16], sizes = [8, 8], strides = [1, 1]} : vector<8x32xbf16> to vector<8x8xbf16>
    %50 = vector.extract_strided_slice %3 {offsets = [0, 16], sizes = [8, 8], strides = [1, 1]} : vector<8x32xbf16> to vector<8x8xbf16>
    %51 = vector.extract_strided_slice %5 {offsets = [0, 16], sizes = [8, 8], strides = [1, 1]} : vector<8x32xbf16> to vector<8x8xbf16>
    %cst_19 = arith.constant dense<0.000000e+00> : vector<8x8xf32>
    %52 = tpu.matmul %49, %50, %cst_19 {dimension_numbers = #tpu.dot_dimension_numbers<[1], [1], [0], [0], [0, 0, 1, 0], [], []>} : vector<8x8xbf16>, vector<8x8xbf16>, vector<8x8xf32> -> vector<8x8xf32>
    %53 = arith.addf %52, %8 : vector<8x8xf32>
    %cst_20 = arith.constant dense<0xFF800000> : vector<8xf32>
    %54 = vector.multi_reduction <maximumf>, %53, %cst_20 [1] : vector<8x8xf32> to vector<8xf32>
    %55 = vector.shape_cast %54 : vector<8xf32> to vector<8x1xf32>
    %56 = vector.broadcast %55 : vector<8x1xf32> to vector<8x8xf32>
    %57 = arith.subf %53, %56 : vector<8x8xf32>
    %58 = arith.truncf %57 : vector<8x8xf32> to vector<8x8xbf16>
    %59 = math.exp %58 : vector<8x8xbf16>
    %60 = arith.extf %59 : vector<8x8xbf16> to vector<8x8xf32>
    %cst_21 = arith.constant dense<0.000000e+00> : vector<8xf32>
    %61 = vector.multi_reduction <add>, %60, %cst_21 [1] : vector<8x8xf32> to vector<8xf32>
    %62 = vector.shape_cast %61 : vector<8xf32> to vector<8x1xf32>
    %63 = tpu.reciprocal %62 {approx = true} : vector<8x1xf32> -> vector<8x1xf32>
    %64 = vector.broadcast %63 : vector<8x1xf32> to vector<8x8xf32>
    %65 = arith.mulf %60, %64 : vector<8x8xf32>
    %66 = arith.truncf %65 : vector<8x8xf32> to vector<8x8xbf16>
    %cst_22 = arith.constant dense<0.000000e+00> : vector<8x8xf32>
    %67 = tpu.matmul %66, %51, %cst_22 {dimension_numbers = #tpu.dot_dimension_numbers<[1], [0], [0], [1], [0, 0, 1, 1], [], []>} : vector<8x8xbf16>, vector<8x8xbf16>, vector<8x8xf32> -> vector<8x8xf32>
    %68 = arith.truncf %67 : vector<8x8xf32> to vector<8x8xbf16>
    %69 = vector.extract_strided_slice %1 {offsets = [0, 24], sizes = [8, 8], strides = [1, 1]} : vector<8x32xbf16> to vector<8x8xbf16>
    %70 = vector.extract_strided_slice %3 {offsets = [0, 24], sizes = [8, 8], strides = [1, 1]} : vector<8x32xbf16> to vector<8x8xbf16>
    %71 = vector.extract_strided_slice %5 {offsets = [0, 24], sizes = [8, 8], strides = [1, 1]} : vector<8x32xbf16> to vector<8x8xbf16>
    %cst_23 = arith.constant dense<0.000000e+00> : vector<8x8xf32>
    %72 = tpu.matmul %69, %70, %cst_23 {dimension_numbers = #tpu.dot_dimension_numbers<[1], [1], [0], [0], [0, 0, 1, 0], [], []>} : vector<8x8xbf16>, vector<8x8xbf16>, vector<8x8xf32> -> vector<8x8xf32>
    %73 = arith.addf %72, %8 : vector<8x8xf32>
    %cst_24 = arith.constant dense<0xFF800000> : vector<8xf32>
    %74 = vector.multi_reduction <maximumf>, %73, %cst_24 [1] : vector<8x8xf32> to vector<8xf32>
    %75 = vector.shape_cast %74 : vector<8xf32> to vector<8x1xf32>
    %76 = vector.broadcast %75 : vector<8x1xf32> to vector<8x8xf32>
    %77 = arith.subf %73, %76 : vector<8x8xf32>
    %78 = arith.truncf %77 : vector<8x8xf32> to vector<8x8xbf16>
    %79 = math.exp %78 : vector<8x8xbf16>
    %80 = arith.extf %79 : vector<8x8xbf16> to vector<8x8xf32>
    %cst_25 = arith.constant dense<0.000000e+00> : vector<8xf32>
    %81 = vector.multi_reduction <add>, %80, %cst_25 [1] : vector<8x8xf32> to vector<8xf32>
    %82 = vector.shape_cast %81 : vector<8xf32> to vector<8x1xf32>
    %83 = tpu.reciprocal %82 {approx = true} : vector<8x1xf32> -> vector<8x1xf32>
    %84 = vector.broadcast %83 : vector<8x1xf32> to vector<8x8xf32>
    %85 = arith.mulf %80, %84 : vector<8x8xf32>
    %86 = arith.truncf %85 : vector<8x8xf32> to vector<8x8xbf16>
    %cst_26 = arith.constant dense<0.000000e+00> : vector<8x8xf32>
    %87 = tpu.matmul %86, %71, %cst_26 {dimension_numbers = #tpu.dot_dimension_numbers<[1], [0], [0], [1], [0, 0, 1, 1], [], []>} : vector<8x8xbf16>, vector<8x8xbf16>, vector<8x8xf32> -> vector<8x8xf32>
    %88 = arith.truncf %87 : vector<8x8xf32> to vector<8x8xbf16>
    %89 = tpu.concatenate %28, %48, %68, %88 in 1 : vector<8x8xbf16>, vector<8x8xbf16>, vector<8x8xbf16>, vector<8x8xbf16> -> vector<8x32xbf16>
    %c0_27 = arith.constant 0 : index
    %c0_28 = arith.constant 0 : index
    %90 = vector.load %arg6[%c0_27, %c0_28] : memref<32x32xbf16, #tpu.memory_space<vmem>>, vector<32x32xbf16>
    %cst_29 = arith.constant dense<0.000000e+00> : vector<8x32xf32>
    %91 = tpu.matmul %89, %90, %cst_29 {dimension_numbers = #tpu.dot_dimension_numbers<[1], [0], [0], [1], [0, 0, 1, 1], [], []>} : vector<8x32xbf16>, vector<32x32xbf16>, vector<8x32xf32> -> vector<8x32xf32>
    %c0_30 = arith.constant 0 : index
    %c0_31 = arith.constant 0 : index
    %92 = vector.load %arg7[%c0_30, %c0_31] : memref<1x32xbf16, #tpu.memory_space<vmem>>, vector<1x32xbf16>
    %93 = arith.extf %92 : vector<1x32xbf16> to vector<1x32xf32>
    %94 = vector.broadcast %93 : vector<1x32xf32> to vector<8x32xf32>
    %95 = arith.addf %91, %94 : vector<8x32xf32>
    %c0_32 = arith.constant 0 : index
    %c0_33 = arith.constant 0 : index
    %c0_34 = arith.constant 0 : index
    %96 = vector.load %arg14[%c0_32, %c0_33, %c0_34] : memref<1x8x32xf32, #tpu.memory_space<vmem>>, vector<1x8x32xf32>
    %97 = vector.shape_cast %96 : vector<1x8x32xf32> to vector<8x32xf32>
    %98 = arith.addf %95, %97 : vector<8x32xf32>
    %c0_35 = arith.constant 0 : index
    %c0_36 = arith.constant 0 : index
    %99 = vector.load %arg8[%c0_35, %c0_36] : memref<1x32xf32, #tpu.memory_space<vmem>>, vector<1x32xf32>
    %c0_37 = arith.constant 0 : index
    %c0_38 = arith.constant 0 : index
    %100 = vector.load %arg9[%c0_37, %c0_38] : memref<1x32xf32, #tpu.memory_space<vmem>>, vector<1x32xf32>
    %cst_39 = arith.constant dense<0.000000e+00> : vector<8xf32>
    %101 = vector.multi_reduction <add>, %98, %cst_39 [1] : vector<8x32xf32> to vector<8xf32>
    %102 = vector.shape_cast %101 : vector<8xf32> to vector<8x1xf32>
    %cst_40 = arith.constant 3.200000e+01 : f32
    %103 = vector.broadcast %cst_40 : f32 to vector<8x1xf32>
    %104 = arith.divf %102, %103 : vector<8x1xf32>
    %105 = vector.broadcast %104 : vector<8x1xf32> to vector<8x32xf32>
    %106 = arith.subf %98, %105 : vector<8x32xf32>
    %107 = arith.mulf %106, %106 : vector<8x32xf32>
    %cst_41 = arith.constant dense<0.000000e+00> : vector<8xf32>
    %108 = vector.multi_reduction <add>, %107, %cst_41 [1] : vector<8x32xf32> to vector<8xf32>
    %109 = vector.shape_cast %108 : vector<8xf32> to vector<8x1xf32>
    %cst_42 = arith.constant 0.0322580636 : f32
    %110 = vector.broadcast %cst_42 : f32 to vector<8x1xf32>
    %111 = arith.mulf %109, %110 : vector<8x1xf32>
    %112 = math.sqrt %111 : vector<8x1xf32>
    %cst_43 = arith.constant 9.99999997E-7 : f32
    %113 = vector.broadcast %cst_43 : f32 to vector<8x1xf32>
    %114 = arith.addf %112, %113 : vector<8x1xf32>
    %115 = vector.broadcast %114 : vector<8x1xf32> to vector<8x32xf32>
    %116 = arith.divf %106, %115 : vector<8x32xf32>
    %117 = vector.broadcast %99 : vector<1x32xf32> to vector<8x32xf32>
    %118 = arith.mulf %117, %116 : vector<8x32xf32>
    %119 = vector.broadcast %100 : vector<1x32xf32> to vector<8x32xf32>
    %120 = arith.addf %118, %119 : vector<8x32xf32>
    %121 = arith.truncf %120 : vector<8x32xf32> to vector<8x32xbf16>
    %c0_44 = arith.constant 0 : index
    %c0_45 = arith.constant 0 : index
    %122 = vector.load %arg10[%c0_44, %c0_45] : memref<32x64xbf16, #tpu.memory_space<vmem>>, vector<32x64xbf16>
    %cst_46 = arith.constant dense<0.000000e+00> : vector<8x64xf32>
    %123 = tpu.matmul %121, %122, %cst_46 {dimension_numbers = #tpu.dot_dimension_numbers<[1], [0], [0], [1], [0, 0, 1, 1], [], []>} : vector<8x32xbf16>, vector<32x64xbf16>, vector<8x64xf32> -> vector<8x64xf32>
    %c0_47 = arith.constant 0 : index
    %c0_48 = arith.constant 0 : index
    %124 = vector.load %arg11[%c0_47, %c0_48] : memref<1x64xbf16, #tpu.memory_space<vmem>>, vector<1x64xbf16>
    %125 = arith.extf %124 : vector<1x64xbf16> to vector<1x64xf32>
    %126 = vector.broadcast %125 : vector<1x64xf32> to vector<8x64xf32>
    %127 = arith.addf %123, %126 : vector<8x64xf32>
    %cst_49 = arith.constant 0.000000e+00 : f32
    %128 = vector.broadcast %cst_49 : f32 to vector<8x64xf32>
    %129 = arith.maximumf %127, %128 : vector<8x64xf32>
    %130 = arith.truncf %129 : vector<8x64xf32> to vector<8x64xbf16>
    %c0_50 = arith.constant 0 : index
    %c0_51 = arith.constant 0 : index
    %131 = vector.load %arg12[%c0_50, %c0_51] : memref<64x32xbf16, #tpu.memory_space<vmem>>, vector<64x32xbf16>
    %cst_52 = arith.constant dense<0.000000e+00> : vector<8x32xf32>
    %132 = tpu.matmul %130, %131, %cst_52 {dimension_numbers = #tpu.dot_dimension_numbers<[1], [0], [0], [1], [0, 0, 1, 1], [], []>} : vector<8x64xbf16>, vector<64x32xbf16>, vector<8x32xf32> -> vector<8x32xf32>
    %c0_53 = arith.constant 0 : index
    %c0_54 = arith.constant 0 : index
    %133 = vector.load %arg13[%c0_53, %c0_54] : memref<1x32xbf16, #tpu.memory_space<vmem>>, vector<1x32xbf16>
    %134 = arith.extf %133 : vector<1x32xbf16> to vector<1x32xf32>
    %135 = vector.broadcast %134 : vector<1x32xf32> to vector<8x32xf32>
    %136 = arith.addf %132, %135 : vector<8x32xf32>
    %137 = arith.addf %98, %136 : vector<8x32xf32>
    %c0_55 = arith.constant 0 : index
    %c0_56 = arith.constant 0 : index
    %c0_57 = arith.constant 0 : index
    %138 = vector.load %arg15[%c0_55, %c0_56, %c0_57] : memref<1x8x32xf32, #tpu.memory_space<vmem>>, vector<1x8x32xf32>
    %139 = vector.shape_cast %138 : vector<1x8x32xf32> to vector<8x32xf32>
    %140 = vector.shape_cast %137 : vector<8x32xf32> to vector<1x8x32xf32>
    tpu.vector_store %arg15[%c0_55, %c0_56, %c0_57], %140 {strides = array<i32>} : memref<1x8x32xf32, #tpu.memory_space<vmem>>, vector<1x8x32xf32>,
    return
  }
  func.func @transform_0(%arg0: i32, %arg1: i32) -> (i32, i32, i32) {
    %c0_i32 = arith.constant 0 : i32
    %c0_i32_0 = arith.constant 0 : i32
    return %arg0, %arg1, %c0_i32 : i32, i32, i32
  }
  func.func @transform_1(%arg0: i32, %arg1: i32) -> (i32, i32, i32) {
    %c0_i32 = arith.constant 0 : i32
    %c0_i32_0 = arith.constant 0 : i32
    %c0_i32_1 = arith.constant 0 : i32
    return %arg0, %c0_i32, %c0_i32_0 : i32, i32, i32
  }
  func.func @transform_2(%arg0: i32, %arg1: i32) -> (i32, i32, i32) {
    %c0_i32 = arith.constant 0 : i32
    %c0_i32_0 = arith.constant 0 : i32
    %c0_i32_1 = arith.constant 0 : i32
    return %arg0, %c0_i32, %c0_i32_0 : i32, i32, i32
  }
  func.func @transform_3(%arg0: i32, %arg1: i32) -> (i32, i32, i32, i32) {
    %c0_i32 = arith.constant 0 : i32
    %c0_i32_0 = arith.constant 0 : i32
    %c0_i32_1 = arith.constant 0 : i32
    return %arg0, %c0_i32, %arg1, %c0_i32_0 : i32, i32, i32, i32
  }
  func.func @transform_4(%arg0: i32, %arg1: i32) -> (i32, i32) {
    %c0_i32 = arith.constant 0 : i32
    %c0_i32_0 = arith.constant 0 : i32
    %c0_i32_1 = arith.constant 0 : i32
    return %c0_i32, %c0_i32_0 : i32, i32
  }
  func.func @transform_5(%arg0: i32, %arg1: i32) -> (i32, i32) {
    %c0_i32 = arith.constant 0 : i32
    %c0_i32_0 = arith.constant 0 : i32
    %c0_i32_1 = arith.constant 0 : i32
    return %c0_i32, %c0_i32_0 : i32, i32
  }
  func.func @transform_6(%arg0: i32, %arg1: i32) -> (i32, i32) {
    %c0_i32 = arith.constant 0 : i32
    %c0_i32_0 = arith.constant 0 : i32
    %c0_i32_1 = arith.constant 0 : i32
    return %c0_i32, %c0_i32_0 : i32, i32
  }
  func.func @transform_7(%arg0: i32, %arg1: i32) -> (i32, i32) {
    %c0_i32 = arith.constant 0 : i32
    %c0_i32_0 = arith.constant 0 : i32
    %c0_i32_1 = arith.constant 0 : i32
    return %c0_i32, %c0_i32_0 : i32, i32
  }
  func.func @transform_8(%arg0: i32, %arg1: i32) -> (i32, i32) {
    %c0_i32 = arith.constant 0 : i32
    %c0_i32_0 = arith.constant 0 : i32
    %c0_i32_1 = arith.constant 0 : i32
    return %c0_i32, %c0_i32_0 : i32, i32
  }
  func.func @transform_9(%arg0: i32, %arg1: i32) -> (i32, i32) {
    %c0_i32 = arith.constant 0 : i32
    %c0_i32_0 = arith.constant 0 : i32
    %c0_i32_1 = arith.constant 0 : i32
    return %c0_i32, %c0_i32_0 : i32, i32
  }
  func.func @transform_10(%arg0: i32, %arg1: i32) -> (i32, i32) {
    %c0_i32 = arith.constant 0 : i32
    %c0_i32_0 = arith.constant 0 : i32
    %c0_i32_1 = arith.constant 0 : i32
    return %c0_i32, %c0_i32_0 : i32, i32
  }
  func.func @transform_11(%arg0: i32, %arg1: i32) -> (i32, i32) {
    %c0_i32 = arith.constant 0 : i32
    %c0_i32_0 = arith.constant 0 : i32
    %c0_i32_1 = arith.constant 0 : i32
    return %c0_i32, %c0_i32_0 : i32, i32
  }
  func.func @transform_12(%arg0: i32, %arg1: i32) -> (i32, i32, i32) {
    %c0_i32 = arith.constant 0 : i32
    %c0_i32_0 = arith.constant 0 : i32
    return %arg0, %arg1, %c0_i32 : i32, i32, i32
  }
  func.func @transform_13(%arg0: i32, %arg1: i32) -> (i32, i32, i32) {
    %c0_i32 = arith.constant 0 : i32
    %c0_i32_0 = arith.constant 0 : i32
    return %arg0, %arg1, %c0_i32 : i32, i32, i32
  }
}

</mosaic_0001>

<bundles_post_ra>
// kernel: encoder_block.2
= control target key start
LH: loop header
LB: loop body
LE: loop exit
PB: predicated region body
PF: predicated region fallthrough
CT: control target
= control target key end

     0   :  { %s1630_s0 = inlined_call_operand.hbm [shape: f32[2,8,32], index: 0, kind: input, shape index: {}]   ;;  %s1631_s1 = inlined_call_operand.hbm [shape: f32[1,32], index: 1, kind: input, shape index: {}]   ;;  %s1632_s2 = inlined_call_operand.hbm [shape: f32[1,32], index: 2, kind: input, shape index: {}]   ;;  %s1633_s3 = inlined_call_operand.hbm [shape: bf16[32,96], index: 3, kind: input, shape index: {}]   ;;  %s1634_s4 = inlined_call_operand.hbm [shape: bf16[1,96], index: 4, kind: input, shape index: {}]   ;;  %s1635_s5 = inlined_call_operand.hbm [shape: bf16[2,8,32], index: 5, kind: output, shape index: {0}]   ;;  %s1636_s6 = inlined_call_operand.hbm [shape: bf16[2,8,32], index: 6, kind: output, shape index: {1}]   ;;  %s1637_s7 = inlined_call_operand.hbm [shape: bf16[2,8,32], index: 7, kind: output, shape index: {2}]  }
   0x1   :  { %1642 = sst [smem:[#allocation20_spill]] %s1631_s1 }
   0x2   :  { %1643 = sst [smem:[#allocation21_spill]] %s1632_s2 }
   0x3   :  { %13 = vsyncpa [#allocation3], 0 }
   0x4   :  { %15 = vsyncpa [#allocation3 + $0x1], 0 }
   0x5   :  { %16 = vsyncpa [#allocation6], 0 }
   0x6   :  { %17 = vsyncpa [#allocation9], 0 }
   0x7   :  { %18 = vsyncpa [#allocation4], 0 }
   0x8   :  { %20 = vsyncpa [#allocation4 + $0x1], 0 }
   0x9   :  { %21 = vsyncpa [#allocation13], 0 }
   0xa   :  { %23 = vsyncpa [#allocation13 + $0x1], 0  ;;  %s1257_s24 = smov 0   ;;  %s1259_s25 = smov 0  }
   0xb   :  { %s1261_s26 = smov 0   ;;  %s1263_s27 = smov 0  }
   0xc   :  { %s1265_s28 = smov 0   ;;  %s1267_s29 = smov 0  }
   0xd LB: > { %s1288_s30 = sadd.s32 4294967295, %s1201_s29   ;;  %p741_p0 = scmp.ge.s32.totalorder %s1201_s29, 1  ;;  %s1201_s29 = sphi %s1267_s29, %s29_s29   ;;  %s1197_s28 = sphi %s1265_s28, %s1668_s28   ;;  %s1193_s27 = sphi %s1263_s27, %s1667_s27   ;;  %s1189_s26 = sphi %s1261_s26, %s1666_s26   ;;  %s1185_s25 = sphi %s1259_s25, %s1665_s25   ;;  %s1181_s24 = sphi %s1257_s24, %s1664_s24  }
   0xe   : > { %p1638_p1 = scmp.eq.s32.totalorder %s1288_s30, 0  ;;  %p242_p2 = scmp.lt.s32.totalorder %s1201_s29, 3 }
   0xf   : > { %s1203_s9 = smov [#allocation5]   ;;  %s1204_s11 = smov [#allocation8]  }
  0x10   : > { %p1293_p3 = pnand %p741_p0, %p242_p2  ;;  %s255_s10 = sshll.u32 %s1203_s9, 4  ;;  %s256_s10 = int_to_ptr.vmem [resolvable:$true] %s255_s10 }
  0x11   : > { %s276_s12 = sshll.u32 %s1204_s11, 4  ;;  %s1205_s14 = smov [#allocation7]   ;;  %s1306_s12 = int_to_ptr.vmem [resolvable:$true] %s276_s12 }
  0x12   : > { %s1644_s8 = scalar_select %p1293_p3, 1, 0 }
  0x13   : > { %p808_p5 = pneg %p1293_p3  ;;  %s1308_s15 = sshll.u32 %s1205_s14, 4  ;;  %s267_s15 = int_to_ptr.vmem [resolvable:$true] %s1308_s15 }
  0x14   : > { %s1646_s1 = sld [smem:[#allocation20_spill]] }
  0x15   : > { %p1302_p6 = pnand %p808_p5, %p1638_p1 }
  0x17   : > { %p1318_p8 = pneg %p1302_p6 }
  0x1a   : > { %s909_s18 = scalar_lea.hbm %s1646_s1, 16 }
  0x1b   : > { %p910_p7 = scmp.ne.s32.totalorder %s1646_s1, %s909_s18  ;;  %p916_p11 = scmp.lt.u32.totalorder %s909_s18, %s1646_s1 }
  0x1d   : > { %p912_p9 = pnand %p1318_p8, %p910_p7 }
  0x1f   : > { %p913_p10 = pneg %p912_p9 }
  0x21   : > { %p918_p12 = pnand %p916_p11, %p913_p10 }
  0x23   : > { %921 = shalt.err (!%p918_p12)
}
  0x24   : > { %s922_s9 = scalar_lea.vmem %s256_s10, 16  ;;  %s929_s11 = scalar_lea.vmem %s256_s10, 32 }
  0x25   : > { %p923_p13 = scmp.ne.s32.totalorder %s256_s10, %s922_s9  ;;  %p930_p5 = scmp.lt.s32.totalorder %s256_s10, %s256_s10 }
  0x26   : > { %p931_p4 = scmp.lt.s32.totalorder %s929_s11, %s922_s9 }
  0x27   : > { %p925_p0 = pnand %p923_p13, %p1318_p8 }
  0x28   : > { %p932_p1 = por %p931_p4, %p930_p5 }
  0x29   : > { %p926_p2 = pneg %p925_p0 }
  0x2b   : > { %p933_p3 = pnand %p932_p1, %p926_p2 }
  0x2d   : > { %936 = shalt.err (!%p933_p3)
}
  0x2e   : > { %811 = dma.hbm_to_vmem [thread:$0]  (!%p1302_p6), %s1646_s1, 16, %s256_s10, [#allocation6]  }
  0x2f   : > { %s937_s19 = scalar_lea.hbm %s1633_s3, 256 }
  0x30   : > { %p938_p7 = scmp.ne.s32.totalorder %s1633_s3, %s937_s19  ;;  %p944_p1 = scmp.lt.u32.totalorder %s937_s19, %s1633_s3 }
  0x32   : > { %p940_p9 = pnand %p938_p7, %p1318_p8 }
  0x34   : > { %p941_p4 = pneg %p940_p9 }
  0x36   : > { %p946_p3 = pnand %p944_p1, %p941_p4 }
  0x38   : > { %949 = shalt.err (!%p946_p3)
}
  0x39   : > { %s950_s10 = scalar_lea.vmem %s1306_s12, 256  ;;  %p958_p13 = scmp.lt.s32.totalorder %s1306_s12, %s1306_s12 }
  0x3a   : > { %p951_p10 = scmp.ne.s32.totalorder %s1306_s12, %s950_s10  ;;  %p959_p0 = scmp.lt.s32.totalorder %s950_s10, %s950_s10 }
  0x3c   : > { %p953_p11 = pnand %p951_p10, %p1318_p8  ;;  %p960_p2 = por %p959_p0, %p958_p13 }
  0x3e   : > { %p954_p12 = pneg %p953_p11 }
  0x40   : > { %p961_p5 = pnand %p960_p2, %p954_p12 }
  0x42   : > { %964 = shalt.err (!%p961_p5)
}
  0x43   : > { %s1206_s11 = smov 64   ;;  %s1207_s14 = smov 4  }
  0x44   : > { %817 = dma.hbm_to_vmem [thread:$0]  (!%p1302_p6), %s1633_s3, 256, %s1306_s12, [#allocation9], %s1206_s11, %s1206_s11, %s1207_s14  }
  0x45   : > { %s1648_s2 = sld [smem:[#allocation21_spill]] }
  0x4b   : > { %s965_s20 = scalar_lea.hbm %s1648_s2, 16 }
  0x4c   : > { %p966_p7 = scmp.ne.s32.totalorder %s1648_s2, %s965_s20  ;;  %p972_p1 = scmp.lt.u32.totalorder %s965_s20, %s1648_s2 }
  0x4e   : > { %p968_p9 = pnand %p966_p7, %p1318_p8 }
  0x50   : > { %p969_p4 = pneg %p968_p9 }
  0x52   : > { %p974_p3 = pnand %p972_p1, %p969_p4 }
  0x54   : > { %977 = shalt.err (!%p974_p3)
}
  0x55   : > { %s978_s16 = scalar_lea.vmem %s267_s15, 16  ;;  %s985_s12 = scalar_lea.vmem %s267_s15, 32 }
  0x56   : > { %p979_p10 = scmp.ne.s32.totalorder %s267_s15, %s978_s16  ;;  %p986_p13 = scmp.lt.s32.totalorder %s267_s15, %s267_s15 }
  0x57   : > { %p987_p0 = scmp.lt.s32.totalorder %s985_s12, %s978_s16 }
  0x58   : > { %p981_p11 = pnand %p979_p10, %p1318_p8 }
  0x59   : > { %p988_p2 = por %p987_p0, %p986_p13 }
  0x5a   : > { %p982_p12 = pneg %p981_p11 }
  0x5c   : > { %p989_p5 = pnand %p988_p2, %p982_p12 }
  0x5e   : > { %992 = shalt.err (!%p989_p5)
}
  0x5f   : > { %814 = dma.hbm_to_vmem [thread:$0]  (!%p1302_p6), %s1648_s2, 16, %s267_s15, [#allocation6]  }
  0x60   : > { %s1208_s17 = smov [#allocation10]   ;;  %s993_s22 = scalar_lea.hbm %s1634_s4, 16 }
  0x61   : > { %s290_s18 = sshll.u32 %s1208_s17, 4  ;;  %p994_p7 = scmp.ne.s32.totalorder %s1634_s4, %s993_s22  ;;  %s291_s18 = int_to_ptr.vmem [resolvable:$true] %s290_s18 }
  0x62   : > { %p1000_p1 = scmp.lt.u32.totalorder %s993_s22, %s1634_s4 }
  0x63   : > { %p996_p9 = pnand %p994_p7, %p1318_p8 }
  0x65   : > { %p997_p4 = pneg %p996_p9 }
  0x67   : > { %p1002_p3 = pnand %p1000_p1, %p997_p4 }
  0x69   : > { %1005 = shalt.err (!%p1002_p3)
}
  0x6a   : > { %s1006_s15 = scalar_lea.vmem %s291_s18, 16  ;;  %s1013_s12 = scalar_lea.vmem %s291_s18, 32 }
  0x6b   : > { %p1007_p10 = scmp.ne.s32.totalorder %s291_s18, %s1006_s15  ;;  %p1014_p13 = scmp.lt.s32.totalorder %s291_s18, %s291_s18 }
  0x6c   : > { %p1015_p0 = scmp.lt.s32.totalorder %s1013_s12, %s1006_s15 }
  0x6d   : > { %p1009_p11 = pnand %p1007_p10, %p1318_p8 }
  0x6e   : > { %p1016_p2 = por %p1015_p0, %p1014_p13 }
  0x6f   : > { %p1010_p12 = pneg %p1009_p11 }
  0x71   : > { %p1017_p5 = pnand %p1016_p2, %p1010_p12 }
  0x73   : > { %1020 = shalt.err (!%p1017_p5)
}
  0x74   : > { %820 = dma.hbm_to_vmem [thread:$0]  (!%p1302_p6), %s1634_s4, 16, %s291_s18, [#allocation9]  }
  0x75   : > { %s1640_s21 = sadd.s32 4294967294, %s1201_s29   ;;  %s41_s17 = sadd.s32 1, %s1197_s28 }
  0x76   : > { %p43_p8 = scmp.ge.s32.totalorder %s41_s17, 2  ;;  %s50_s13 = sadd.s32 1, %s1189_s26 }
  0x77   : > { %p57_p7 = scmp.ne.s32.totalorder %s1189_s26, %s1185_s25  ;;  %p58_p9 = scmp.eq.s32.totalorder %s1201_s29, 0 }
  0x78   : > { %s1670_s17 = smov (%p43_p8, %s41_s17), 0  ;;  %p63_p1 = scmp.ne.s32.totalorder %s1185_s25, %s1181_s24 }
  0x79   : > { %p1402_p4 = por %p58_p9, %p57_p7  ;;  %s45_s18 = ssub.s32 %s1197_s28, %s1670_s17 }
  0x7a   : > { %p173_p6 = scmp.eq.s32.totalorder %s1288_s30, 1  ;;  %p48_p3 = scmp.eq.s32.totalorder %s45_s18, 0 }
  0x7b   : > { %p1650_p10 = scmp.eq.s32.totalorder %s1288_s30, 0  ;;  %p179_p13 = scmp.eq.s32.totalorder %s1640_s21, 1 }
  0x7c   : > { %p1417_p12 = por %p173_p6, %p57_p7  ;;  %p839_p2 = scmp.lt.s32.totalorder %s1201_s29, 2 }
  0x7d   : > { %p1413_p11 = por %p1650_p10, %p63_p1  ;;  %p1426_p0 = por %p179_p13, %p63_p1 }
  0x7e   : > { %s1652_s22 = scalar_select %p1417_p12, 1, 0 }
  0x7f   : > { %s1424_s23 = scalar_select %p48_p3, %s1189_s26, %s50_s13  }
  0x80   : > { %s1653_s9 = scalar_select %p1426_p0, 1, 0 }
  0x81   : > { %s301_s10 = sand.u32 1, %s1189_s26   ;;  %s748_s16 = sshll.u32 %s1197_s28, 7 }
  0x82   : > { %s747_s15 = sshll.u32 %s301_s10, 3  ;;  %s1436_s14 = scalar_lea.hbm %s1630_s0, %s748_s16 }
  0x83   : > { %s305_s18 = scalar_lea.vmem [#allocation2], %s747_s15  ;;  %p1440_p5 = pnand %p839_p2, %p1402_p4 }
  0x84   : > { %s313_s13 = sshll.u32 %s305_s18, 4  ;;  %s302_s1 = scalar_lea.sflag [#allocation3], %s301_s10  ;;  %s1444_s13 = int_to_ptr.vmem [resolvable:$true] %s313_s13 }
  0x85   : > { %s1021_s2 = scalar_lea.hbm %s1436_s14, 128  ;;  %p1023_p7 = pneg %p1440_p5 }
  0x86   : > { %p1022_p8 = scmp.ne.s32.totalorder %s1436_s14, %s1021_s2  ;;  %s1026_s19 = scalar_lea.hbm %s1630_s0, 256 }
  0x87   : > { %p1027_p4 = scmp.lt.u32.totalorder %s1436_s14, %s1630_s0  ;;  %p1028_p6 = scmp.lt.u32.totalorder %s1026_s19, %s1021_s2 }
  0x88   : > { %p1024_p9 = pnand %p1023_p7, %p1022_p8  ;;  %p1030_p10 = scmp.lt.u32.totalorder %s1021_s2, %s1436_s14 }
  0x89   : > { %p1029_p3 = por %p1028_p6, %p1027_p4 }
  0x8a   : > { %p1025_p1 = pneg %p1024_p9 }
  0x8b   : > { %p1031_p13 = por %p1030_p10, %p1029_p3 }
  0x8d   : > { %p1032_p2 = pnand %p1031_p13, %p1025_p1 }
  0x8f   : > { %1035 = shalt.err (!%p1032_p2)
}
  0x90   : > { %s1036_s10 = scalar_lea.vmem %s1444_s13, 128  ;;  %s1209_s18 = smov [#allocation2]  }
  0x91   : > { %p1037_p8 = scmp.ne.s32.totalorder %s1444_s13, %s1036_s10  ;;  %s1041_s16 = sshll.u32 %s1209_s18, 4  ;;  %s1042_s16 = int_to_ptr.vmem [resolvable:$false] %s1041_s16 }
  0x92   : > { %s1043_s15 = scalar_lea.vmem %s1042_s16, 256  ;;  %p1044_p12 = scmp.lt.s32.totalorder %s1444_s13, %s1042_s16 }
  0x93   : > { %p1039_p9 = pnand %p1037_p8, %p1023_p7  ;;  %p1045_p4 = scmp.lt.s32.totalorder %s1043_s15, %s1036_s10 }
  0x95   : > { %p1040_p0 = pneg %p1039_p9  ;;  %p1046_p6 = por %p1045_p4, %p1044_p12 }
  0x97   : > { %p1047_p3 = pnand %p1046_p6, %p1040_p0 }
  0x99   : > { %1050 = shalt.err (!%p1047_p3)
}
  0x9a   : > { %824 = dma.hbm_to_vmem [thread:$0]  (!%p1440_p5), %s1436_s14, 128, %s1444_s13, %s302_s1  }
  0x9b   : > { %p1655_p1 = scmp.ne.s32.totalorder %s1644_s8, 0 }
  0x9c   : > { %s1474_s2 = sand.u32 (!%p1655_p1), 1, %s1185_s25  }
  0x9d   : > { %322 = sbr.rel (%p1655_p1) target bundleno = 871 (0x367), region = 40  ;;  %s750_s19 = sshll.u32 (!%p1655_p1), %s1474_s2, 3 }
  0x9e   : > { %s325_s12 = scalar_lea.sflag (!%p1655_p1), [#allocation3], %s1474_s2  ;;  %s328_s11 = scalar_lea.vmem (!%p1655_p1), [#allocation2], %s750_s19 }
  0xa4   : > { %1160 = dma.done.wait (%p1413_p11), %s325_s12, 128  }
  0xa5   : > { %1162 = vsyncadd (%p1413_p11), %s325_s12, 4294967168  ;;  %p1656_p12 = scmp.eq.s32.totalorder %s1288_s30, 0 }
  0xa7   : > { %1164 = dma.done.wait (%p1656_p12), [#allocation6], 32   ;;  %p1657_p0 = pmov %p1656_p12 }
  0xa9   : > { %1166 = vsyncadd (%p1657_p0), [#allocation6], 4294967264  ;;  %p1658_p5 = pmov %p1657_p0 }
  0xaa   : > { %p1659_p7 = pmov %p1657_p0 }
  0xab   : > { %1168 = dma.done.wait (%p1658_p5), [#allocation9], 272  }
  0xac   : > { %1170 = vsyncadd (%p1659_p7), [#allocation9], 4294967024  ;;  %vm389_vm0 = vcmask 261120   ;;  %v386_v0 = vld [vmem:[%s328_s11] sm:$0xff]  ;;  %v903_v7 = vld [vmem:[#allocation8] sm:$0xff]   ;;  %v1210_v8 = vmov 0.0   ;;  %v432_v25 = vlaneseq }
  0xad   : > { %v390_v1 = vsel %vm389_vm0, %v386_v0, 0.0  ;;  %776 = vmatprep.subr.bf16.mxu0 %v1210_v8  ;;  %vm1211_vm1 = vmmov 0   ;;  %v904_v9 = vld [vmem:[#allocation8 + $0x8] sm:$0xff]   ;;  %v758_v19 = vld [vmem:[#allocation5] ss:$0 sm:$0xff]  ;;  %s1494_s1 = sshll.u32 %s1474_s2, 2 }
  0xae   : > { %391 = vadd.xlane.f32.xlu0 %v390_v1  ;;  %780 = vmatprep.mubr.msk.bf16.mxu0 %vm1211_vm1, %v1210_v8  ;;  %v759_v21 = vld [vmem:[#allocation7] ss:$0 sm:$0xff]  ;;  %v433_v26 = vshrl.u32 %v432_v25, 7  ;;  %v430_v27 = vld [vmem:[#allocation10] sm:$0x1]  ;;  %s1497_s8 = sshll.u32 %s1193_s27, 6 }
  0xaf   : > { %777 = vmatpush3.bf16.msra.mxu0 %v903_v7  ;;  %v431_v28 = vunpack.c.l.bf16 %v430_v27  ;;  %s370_s21 = scalar_lea.vmem [#allocation11], %s1494_s1  ;;  %vm492_vm4 = vcmask 257024   ;;  %s1504_s10 = scalar_lea.hbm %s1635_s5, %s1497_s8 }
  0xb0   : > { %778 = vmatprep.subr.bf16.mxu0 %v1210_v8  ;;  %v434_v29 = vsub.s32 0, %v433_v26  ;;  %s530_s20 = sshll.u32 %s370_s21, 4  ;;  %s1212_s27 = smov 96   ;;  %s1506_s20 = int_to_ptr.vmem [resolvable:$true] %s530_s20 }
  0xb1   : > { %s506_s18 = scalar_lea.sflag [#allocation4], %s1474_s2  ;;  %s1051_s16 = scalar_lea.vmem %s1506_s20, 64 }
  0xb2   : > { %v435_v30 = vrot.slane %v431_v28, %v434_v29  ;;  %p1052_p11 = scmp.ne.s32.totalorder %s1506_s20, %s1051_s16  ;;  %p1660_p10 = scmp.ne.s32.totalorder %s1652_s22, 0 }
  0xb3   : > { %779 = vmatpush3.bf16.msra.mxu0 %v904_v9  ;;  %s1213_s15 = smov [#allocation11]  }
  0xb4   : > { %p1053_p13 = pnand %p1052_p11, %p1660_p10  ;;  %s1055_s19 = sshll.u32 %s1213_s15, 4  ;;  %s1056_s19 = int_to_ptr.vmem [resolvable:$false] %s1055_s19 }
  0xb5   : > { %s1057_s12 = scalar_lea.vmem %s1056_s19, 128  ;;  %p1058_p8 = scmp.lt.s32.totalorder %s1506_s20, %s1056_s19 }
  0xb6   : > { %p1054_p2 = pneg %p1053_p13  ;;  %p1059_p9 = scmp.lt.s32.totalorder %s1057_s12, %s1051_s16 }
  0xb8   : > { %p1060_p4 = por %p1059_p9, %p1058_p8 }
  0xba   : > { %p1061_p6 = pnand %p1060_p4, %p1054_p2 }
 0x13b   : > { %v392_v2 = vpop.xlane.xlu0 %391 }
 0x13c   : > { %v394_v3 = vmul.f32 0.03125, %v392_v2 }
 0x13e   : > { %v395_v4 = vsub.f32 %v386_v0, %v394_v3 }
 0x140   : > { %v396_v5 = vmul.f32 %v395_v4, %v395_v4 }
 0x142   : > { %v397_v6 = vsel %vm389_vm0, %v396_v5, 0.0 }
 0x143   : > { %398 = vadd.xlane.f32.xlu0 %v397_v6 }
 0x1d0   : > { %v399_v10 = vpop.xlane.xlu0 %398 }
 0x1d1   : > { %v400_v11 = vmul.f32 0.032258064, %v399_v10 }
 0x1d3   : > { %905 = vrsqrt.f32 %v400_v11  ;;  %vm403_vm2 = vcmp.eq.f32.partialorder %v400_v11, inf  ;;  %v406_v14 = vand.u32 2147483648, %v400_v11  ;;  %vm405_vm3 = vcmp.eq.f32.partialorder %v400_v11, 0.0 }
 0x1dd   : > { %v906_v12 = vpop.eup %905 }
 0x1de   : > { %v402_v13 = vmul.f32 %v906_v12, %v400_v11 }
 0x1e0   : > { %v404_v15 = vsel %vm403_vm2, %v400_v11, %v402_v13 }
 0x1e1   : > { %v407_v16 = vsel %vm405_vm3, %v406_v14, %v404_v15 }
 0x1e2   : > { %v408_v17 = vadd.f32 1e-06, %v407_v16 }
 0x1e4   : > { %907 = vrcp.f32 %v408_v17 }
 0x1ee   : > { %v908_v18 = vpop.eup %907 }
 0x1ef   : > { %v410_v20 = vmul.f32 %v908_v18, %v395_v4 }
 0x1f1   : > { %v417_v22 = vmul.f32 %v758_v19, %v410_v20 }
 0x1f3   : > { %v424_v23 = vadd.f32 %v759_v21, %v417_v22 }
 0x1f5   : > { %v425_v24 = vpack.c.bf16 %v424_v23, %v424_v23 }
 0x1f7   : > { %781 = vmatmul.mubr.msk.bf16.vlgmr.msra.gmra.mrb[0].mxu0 %vm389_vm0, %v425_v24 }
 0x2ca   : > { %v485_v31 = vpop.f32.mrb[0].mxu0 }
 0x2cb   : > { %v486_v32 = vadd.f32 %v485_v31, %v435_v30  ;;  %v782_v33 = vpop.f32.mrb[1].mxu0 }
 0x2cc   : > { %v488_v34 = vpop.f32.mrb[2].mxu0 }
 0x2cd   : > { %v491_v35 = vpack.c.bf16 %v486_v32, %v486_v32  ;;  %v783_v36 = vpop.f32.mrb[3].mxu0 }
 0x2cf   : > { %497 = vrot.lane.b32.xlu1 %v491_v35, %s1212_s27  ;;  %493 = vst.msk [vmem:[%s370_s21] sm:$0xf] %vm492_vm4, %v491_v35 }
 0x2d0   : > { %1064 = shalt.err (!%p1061_p6)
}
 0x2d1   : > { %s1065_s2 = scalar_lea.hbm %s1504_s10, 64  ;;  %s1069_s14 = scalar_lea.hbm %s1635_s5, 128 }
 0x2d2   : > { %p1066_p3 = scmp.ne.s32.totalorder %s1504_s10, %s1065_s2  ;;  %p1070_p0 = scmp.lt.u32.totalorder %s1504_s10, %s1635_s5 }
 0x2d3   : > { %p1071_p5 = scmp.lt.u32.totalorder %s1069_s14, %s1065_s2  ;;  %p1073_p11 = scmp.lt.u32.totalorder %s1065_s2, %s1504_s10 }
 0x2d4   : > { %p1067_p1 = pnand %p1066_p3, %p1660_p10 }
 0x2d5   : > { %p1072_p7 = por %p1071_p5, %p1070_p0 }
 0x2d6   : > { %p1068_p12 = pneg %p1067_p1 }
 0x2d7   : > { %p1074_p13 = por %p1073_p11, %p1072_p7 }
 0x2d9   : > { %p1075_p2 = pnand %p1074_p13, %p1068_p12 }
 0x2db   : > { %1078 = shalt.err (!%p1075_p2)
}
 0x2dc   : > { %802 = dma.vmem_to_hbm [thread:$0]  (%p1660_p10), %s1506_s20, 64, %s1504_s10, %s506_s18  }
 0x2dd   : > { %s1214_s16 = smov 64   ;;  %s510_s15 = sand.u32 1, %s1288_s30  }
 0x2de   : > { %501 = vrot.lane.b32.xlu1 %v491_v35, %s1214_s16  ;;  %s377_s19 = scalar_lea.vmem [#allocation12], %s1494_s1  ;;  %s1537_s21 = scalar_lea.hbm %s1636_s6, %s1497_s8 }
 0x2df   : > { %s544_s12 = sshll.u32 %s377_s19, 4  ;;  %s384_s14 = scalar_lea.vmem [#allocation14], %s1494_s1  ;;  %s1539_s12 = int_to_ptr.vmem [resolvable:$true] %s544_s12 }
 0x2e0   : > { %s1544_s13 = sshll.u32 %s384_s14, 4  ;;  %s1547_s30 = scalar_lea.sflag [#allocation13], %s510_s15  ;;  %s1578_s13 = int_to_ptr.vmem [resolvable:$true] %s1544_s13 }
 0x2e1   : > { %s1079_s20 = scalar_lea.vmem %s1539_s12, 64  ;;  %s1215_s10 = smov [#allocation12]  }
 0x2e2   : > { %p1080_p8 = scmp.ne.s32.totalorder %s1539_s12, %s1079_s20  ;;  %s1083_s18 = sshll.u32 %s1215_s10, 4  ;;  %s1084_s18 = int_to_ptr.vmem [resolvable:$false] %s1083_s18 }
 0x2e3   : > { %s1085_s27 = scalar_lea.vmem %s1084_s18, 128  ;;  %p1086_p6 = scmp.lt.s32.totalorder %s1539_s12, %s1084_s18 }
 0x2e4   : > { %p1081_p9 = pnand %p1080_p8, %p1660_p10  ;;  %p1087_p3 = scmp.lt.s32.totalorder %s1085_s27, %s1079_s20 }
 0x2e6   : > { %p1082_p4 = pneg %p1081_p9  ;;  %p1088_p1 = por %p1087_p3, %p1086_p6 }
 0x2e8   : > { %p1089_p12 = pnand %p1088_p1, %p1082_p4 }
 0x341   : > { %v498_v37 = vpop.permute.xlu1 %497 }
 0x342   : > { %500 = vst.msk [vmem:[%s377_s19] sm:$0xf] %vm492_vm4, %v498_v37 }
 0x343   : > { %1092 = shalt.err (!%p1089_p12)
}
 0x344   : > { %s1093_s16 = scalar_lea.hbm %s1537_s21, 64  ;;  %s1097_s2 = scalar_lea.hbm %s1636_s6, 128 }
 0x345   : > { %p1094_p0 = scmp.ne.s32.totalorder %s1537_s21, %s1093_s16  ;;  %p1098_p11 = scmp.lt.u32.totalorder %s1537_s21, %s1636_s6 }
 0x346   : > { %p1099_p13 = scmp.lt.u32.totalorder %s1097_s2, %s1093_s16  ;;  %p1101_p8 = scmp.lt.u32.totalorder %s1093_s16, %s1537_s21 }
 0x347   : > { %p1095_p5 = pnand %p1094_p0, %p1660_p10 }
 0x348   : > { %p1100_p2 = por %p1099_p13, %p1098_p11 }
 0x349   : > { %p1096_p7 = pneg %p1095_p5 }
 0x34a   : > { %p1102_p9 = por %p1101_p8, %p1100_p2 }
 0x34c   : > { %p1103_p4 = pnand %p1102_p9, %p1096_p7 }
 0x34e   : > { %1106 = shalt.err (!%p1103_p4)
}
 0x34f   : > { %803 = dma.vmem_to_hbm [thread:$0]  (%p1660_p10), %s1539_s12, 64, %s1537_s21, %s1547_s30  }
 0x350   : > { %s1575_s27 = scalar_lea.hbm %s1637_s7, %s1497_s8  ;;  %v502_v38 = vpop.permute.xlu1 %501  ;;  %s1107_s16 = scalar_lea.vmem %s1578_s13, 64 }
 0x351   : > { %504 = vst.msk [vmem:[%s384_s14] sm:$0xf] %vm492_vm4, %v502_v38  ;;  %p1108_p6 = scmp.ne.s32.totalorder %s1578_s13, %s1107_s16  ;;  %s1216_s12 = smov [#allocation14]  }
 0x352   : > { %s1111_s21 = sshll.u32 %s1216_s12, 4  ;;  %s1112_s21 = int_to_ptr.vmem [resolvable:$false] %s1111_s21 }
 0x353   : > { %p1109_p3 = pnand %p1108_p6, %p1660_p10  ;;  %s1113_s15 = scalar_lea.vmem %s1112_s21, 128 }
 0x354   : > { %p1114_p12 = scmp.lt.s32.totalorder %s1578_s13, %s1112_s21  ;;  %p1115_p0 = scmp.lt.s32.totalorder %s1113_s15, %s1107_s16 }
 0x355   : > { %p1110_p1 = pneg %p1109_p3 }
 0x356   : > { %p1116_p5 = por %p1115_p0, %p1114_p12 }
 0x358   : > { %p1117_p7 = pnand %p1116_p5, %p1110_p1 }
 0x35a   : > { %1120 = shalt.err (!%p1117_p7)
}
 0x35b   : > { %s1121_s1 = scalar_lea.hbm %s1575_s27, 64  ;;  %s1125_s19 = scalar_lea.hbm %s1637_s7, 128 }
 0x35c   : > { %p1122_p11 = scmp.ne.s32.totalorder %s1575_s27, %s1121_s1  ;;  %p1126_p8 = scmp.lt.u32.totalorder %s1575_s27, %s1637_s7 }
 0x35d   : > { %p1127_p9 = scmp.lt.u32.totalorder %s1125_s19, %s1121_s1  ;;  %p1129_p6 = scmp.lt.u32.totalorder %s1121_s1, %s1575_s27 }
 0x35e   : > { %p1123_p13 = pnand %p1122_p11, %p1660_p10 }
 0x35f   : > { %p1128_p4 = por %p1127_p9, %p1126_p8 }
 0x360   : > { %p1124_p2 = pneg %p1123_p13 }
 0x361   : > { %p1130_p3 = por %p1129_p6, %p1128_p4 }
 0x363   : > { %p1131_p1 = pnand %p1130_p3, %p1124_p2 }
 0x365   : > { %1134 = shalt.err (!%p1131_p1)
}
 0x366   : > { %804 = dma.vmem_to_hbm [thread:$0]  (%p1660_p10), %s1578_s13, 64, %s1575_s27, %s1547_s30  }
 0x367 PF: > { %s570_s10 = sand.u32 1, %s1181_s24   ;;  %p1661_p12 = scmp.ne.s32.totalorder %s1653_s9, 0 }
 0x368   : > { %p1662_p0 = scmp.ge.s32.totalorder %s1201_s29, 2  ;;  %s571_s20 = scalar_lea.sflag [#allocation4], %s570_s10 }
 0x36a   : > { %p826_p5 = pnand %p1662_p0, %p1661_p12 }
 0x36c   : > { %1172 = dma.done.wait (!%p826_p5), %s571_s20, 64  }
 0x36d   : > { %1174 = vsyncadd (!%p826_p5), %s571_s20, 4294967232  ;;  %s1663_s18 = sadd.s32 4294967294, %s1201_s29  }
 0x36e   : > { %s579_s16 = sand.u32 1, %s1663_s18  }
 0x36f   : > { %s580_s12 = scalar_lea.sflag [#allocation13], %s579_s16 }
 0x370   : > { %1176 = dma.done.wait (!%p826_p5), %s580_s12, 128  }
 0x371   : > { %1178 = vsyncadd (!%p826_p5), %s580_s12, 4294967168  ;;  %s29_s29 = sadd.s32 1, %s1201_s29   ;;  %s1664_s24 = smov %s1185_s25 }
 0x372   : > { %p26_p10 = scmp.ge.s32.totalorder %s29_s29, 4   ;;  %s1665_s25 = smov %s1189_s26 }
 0x373   : > { %s1666_s26 = smov %s1424_s23  ;;  %s1667_s27 = smov %s1197_s28 }
 0x374   : > { %s1668_s28 = smov %s1670_s17  ;;  %28 = sbr.rel (!%p26_p10) target bundleno = 13 (0xd), region = 133 }
 0x37b   :  { %594 = vsyncpa [#allocation3], 1 }
 0x37c   :  { %596 = vsyncpa [#allocation3 + $0x1], 1 }
 0x37d   :  { %597 = vsyncpa [#allocation6], 1 }
 0x37e   :  { %598 = vsyncpa [#allocation9], 1 }
 0x37f   :  { %599 = vsyncpa [#allocation4], 1 }
 0x380   :  { %601 = vsyncpa [#allocation4 + $0x1], 1 }
 0x381   :  { %602 = vsyncpa [#allocation13], 1 }
 0x382   :  { %604 = vsyncpa [#allocation13 + $0x1], 1 }

// kernel: encoder_block.3
= control target key start
LH: loop header
LB: loop body
LE: loop exit
PB: predicated region body
PF: predicated region fallthrough
CT: control target
= control target key end

     0   :  { %s3326_s0 = inlined_call_operand.hbm [shape: bf16[2,8,32], index: 0, kind: input, shape index: {}]   ;;  %s3327_s1 = inlined_call_operand.hbm [shape: bf16[2,8,32], index: 1, kind: input, shape index: {}]   ;;  %s3328_s2 = inlined_call_operand.hbm [shape: bf16[2,8,32], index: 2, kind: input, shape index: {}]   ;;  %s3329_s3 = inlined_call_operand.hbm [shape: bf16[2,1,8,8], index: 3, kind: input, shape index: {}]   ;;  %s3330_s4 = inlined_call_operand.hbm [shape: bf16[32,32], index: 4, kind: input, shape index: {}]   ;;  %s3331_s5 = inlined_call_operand.hbm [shape: bf16[1,32], index: 5, kind: input, shape index: {}]   ;;  %s3332_s6 = inlined_call_operand.hbm [shape: f32[1,32], index: 6, kind: input, shape index: {}]   ;;  %s3333_s7 = inlined_call_operand.hbm [shape: f32[1,32], index: 7, kind: input, shape index: {}]   ;;  %s3334_s8 = inlined_call_operand.hbm [shape: bf16[32,64], index: 8, kind: input, shape index: {}]   ;;  %s3335_s9 = inlined_call_operand.hbm [shape: bf16[1,64], index: 9, kind: input, shape index: {}]   ;;  %s3336_s10 = inlined_call_operand.hbm [shape: bf16[64,32], index: 10, kind: input, shape index: {}]   ;;  %s3337_s11 = inlined_call_operand.hbm [shape: bf16[1,32], index: 11, kind: input, shape index: {}]   ;;  %s3338_s12 = inlined_call_operand.hbm [shape: f32[2,8,32], index: 12, kind: input, shape index: {}, may-alias: {12,13}]   ;;  %s3339_s13 = inlined_call_operand.hbm [shape: f32[2,8,32], index: 13, kind: output, shape index: {}, may-alias: {12,13}]  }
   0x1   :  { %3372 = sst [smem:[#allocation42_spill]] %s3326_s0 }
   0x2   :  { %3373 = sst [smem:[#allocation43_spill]] %s3327_s1 }
   0x3   :  { %3374 = sst [smem:[#allocation44_spill]] %s3328_s2 }
   0x4   :  { %3375 = sst [smem:[#allocation45_spill]] %s3329_s3 }
   0x5   :  { %3376 = sst [smem:[#allocation46_spill]] %s3330_s4 }
   0x6   :  { %3377 = sst [smem:[#allocation47_spill]] %s3331_s5 }
   0x7   :  { %3378 = sst [smem:[#allocation48_spill]] %s3332_s6 }
   0x8   :  { %3379 = sst [smem:[#allocation49_spill]] %s3333_s7 }
   0x9   :  { %3380 = sst [smem:[#allocation50_spill]] %s3335_s9 }
   0xa   :  { %3381 = sst [smem:[#allocation51_spill]] %s3337_s11 }
   0xb   :  { %3382 = sst [smem:[#allocation52_spill]] %s3338_s12 }
   0xc   :  { %3383 = sst [smem:[#allocation53_spill]] %s3339_s13 }
   0xd   :  { %18 = vsyncpa [#allocation3], 0 }
   0xe   :  { %20 = vsyncpa [#allocation3 + $0x1], 0 }
   0xf   :  { %21 = vsyncpa [#allocation6], 0 }
  0x10   :  { %23 = vsyncpa [#allocation6 + $0x1], 0 }
  0x11   :  { %24 = vsyncpa [#allocation9], 0 }
  0x12   :  { %26 = vsyncpa [#allocation9 + $0x1], 0 }
  0x13   :  { %27 = vsyncpa [#allocation12], 0 }
  0x14   :  { %28 = vsyncpa [#allocation15], 0 }
  0x15   :  { %29 = vsyncpa [#allocation18], 0 }
  0x16   :  { %30 = vsyncpa [#allocation21], 0 }
  0x17   :  { %31 = vsyncpa [#allocation4], 0 }
  0x18   :  { %33 = vsyncpa [#allocation4 + $0x1], 0  ;;  %s2683_s25 = smov 0   ;;  %s2685_s26 = smov 0  }
  0x19   :  { %s2687_s27 = smov 0   ;;  %s2689_s28 = smov 0  }
  0x1a   :  { %s2691_s29 = smov 0   ;;  %s2693_s30 = smov 0  }
  0x1b LB: > { %3384 = sst [smem:[#allocation34_spill]] %s2567_s25  ;;  %s2714_s14 = sadd.s32 4294967295, %s2587_s30   ;;  %s2587_s30 = sphi %s2693_s30, %s39_s30   ;;  %s2583_s29 = sphi %s2691_s29, %s3452_s29   ;;  %s2579_s28 = sphi %s2689_s28, %s3451_s28   ;;  %s2575_s27 = sphi %s2687_s27, %s3450_s27   ;;  %s2571_s26 = sphi %s2685_s26, %s3449_s26   ;;  %s2567_s25 = sphi %s2683_s25, %s3448_s25  }
  0x1c   : > { %3385 = sst [smem:[#allocation35_spill]] %s2579_s28  ;;  %p1729_p0 = scmp.ge.s32.totalorder %s2587_s30, 1 }
  0x1d   : > { %3386 = sst [smem:[#allocation36_spill]] %s2587_s30  ;;  %p3346_p1 = scmp.eq.s32.totalorder %s2714_s14, 0 }
  0x1e   : > { %p388_p2 = scmp.lt.s32.totalorder %s2587_s30, 3  ;;  %s2589_s16 = smov [#allocation10]  }
  0x1f   : > { %s400_s17 = sshll.u32 %s2589_s16, 4  ;;  %s2590_s19 = smov [#allocation11]   ;;  %s2723_s17 = int_to_ptr.vmem [resolvable:$true] %s400_s17 }
  0x20   : > { %p2719_p3 = pnand %p1729_p0, %p388_p2  ;;  %s414_s20 = sshll.u32 %s2590_s19, 4  ;;  %s2734_s20 = int_to_ptr.vmem [resolvable:$true] %s414_s20 }
  0x21   : > { %s2591_s21 = smov [#allocation14]   ;;  %s3390_s4 = sld [smem:[#allocation46_spill]] }
  0x22   : > { %s3387_s15 = scalar_select %p2719_p3, 1, 0 }
  0x23   : > { %p1939_p4 = pneg %p2719_p3  ;;  %s2736_s22 = sshll.u32 %s2591_s21, 4  ;;  %s437_s22 = int_to_ptr.vmem [resolvable:$true] %s2736_s22 }
  0x24   : > { %3388 = sst [smem:[#allocation37_spill]] %s3387_s15 }
  0x25   : > { %p2730_p6 = pnand %p1939_p4, %p3346_p1 }
  0x27   : > { %s3389_s18 = scalar_select %p2730_p6, 1, 0 }
  0x28   : > { %s2099_s16 = scalar_lea.hbm %s3390_s4, 256  ;;  %p2746_p8 = pneg %p2730_p6 }
  0x29   : > { %p2100_p7 = scmp.ne.s32.totalorder %s3390_s4, %s2099_s16  ;;  %p2106_p11 = scmp.lt.u32.totalorder %s2099_s16, %s3390_s4 }
  0x2a   : > { %s3391_s15 = scalar_select %p2746_p8, 1, 0 }
  0x2b   : > { %p2102_p9 = pnand %p2746_p8, %p2100_p7 }
  0x2d   : > { %p2103_p10 = pneg %p2102_p9 }
  0x2f   : > { %p2108_p12 = pnand %p2106_p11, %p2103_p10 }
  0x31   : > { %2111 = shalt.err (!%p2108_p12)
}
  0x32   : > { %s2112_s13 = scalar_lea.vmem %s2723_s17, 256  ;;  %p2120_p4 = scmp.lt.s32.totalorder %s2723_s17, %s2723_s17 }
  0x33   : > { %p2113_p13 = scmp.ne.s32.totalorder %s2723_s17, %s2112_s13  ;;  %p2121_p5 = scmp.lt.s32.totalorder %s2112_s13, %s2112_s13 }
  0x35   : > { %p2115_p0 = pnand %p2113_p13, %p2746_p8  ;;  %p2122_p7 = por %p2121_p5, %p2120_p4 }
  0x37   : > { %p2116_p2 = pneg %p2115_p0 }
  0x39   : > { %p2123_p9 = pnand %p2122_p7, %p2116_p2 }
  0x3b   : > { %2126 = shalt.err (!%p2123_p9)
}
  0x3c   : > { %s3348_s28 = smov 64   ;;  %s3350_s23 = smov 4  }
  0x3d   : > { %1942 = dma.hbm_to_vmem [thread:$0]  (!%p2730_p6), %s3390_s4, 256, %s2723_s17, [#allocation9], %s3348_s28, %s3348_s28, %s3350_s23  }
  0x3e   : > { %s3392_s5 = sld [smem:[#allocation47_spill]] }
  0x44   : > { %s2127_s13 = scalar_lea.hbm %s3392_s5, 16 }
  0x45   : > { %p2128_p5 = scmp.ne.s32.totalorder %s3392_s5, %s2127_s13  ;;  %p2134_p12 = scmp.lt.u32.totalorder %s2127_s13, %s3392_s5 }
  0x47   : > { %p2130_p10 = pnand %p2128_p5, %p2746_p8 }
  0x49   : > { %p2131_p11 = pneg %p2130_p10 }
  0x4b   : > { %p2136_p13 = pnand %p2134_p12, %p2131_p11 }
  0x4d   : > { %2139 = shalt.err (!%p2136_p13)
}
  0x4e   : > { %s2140_s17 = scalar_lea.vmem %s2734_s20, 16  ;;  %s2147_s3 = scalar_lea.vmem %s2734_s20, 32 }
  0x4f   : > { %p2141_p0 = scmp.ne.s32.totalorder %s2734_s20, %s2140_s17  ;;  %p2148_p7 = scmp.lt.s32.totalorder %s2734_s20, %s2734_s20 }
  0x50   : > { %p2149_p9 = scmp.lt.s32.totalorder %s2147_s3, %s2140_s17 }
  0x51   : > { %p2143_p2 = pnand %p2141_p0, %p2746_p8 }
  0x52   : > { %p2150_p5 = por %p2149_p9, %p2148_p7 }
  0x53   : > { %p2144_p4 = pneg %p2143_p2 }
  0x55   : > { %p2151_p10 = pnand %p2150_p5, %p2144_p4 }
  0x57   : > { %2154 = shalt.err (!%p2151_p10)
}
  0x58   : > { %1945 = dma.hbm_to_vmem [thread:$0]  (!%p2730_p6), %s3392_s5, 16, %s2734_s20, [#allocation12]  }
  0x59   : > { %s3393_s7 = sld [smem:[#allocation49_spill]] }
  0x5f   : > { %s2155_s16 = scalar_lea.hbm %s3393_s7, 16 }
  0x60   : > { %p2156_p11 = scmp.ne.s32.totalorder %s3393_s7, %s2155_s16  ;;  %p2162_p0 = scmp.lt.u32.totalorder %s2155_s16, %s3393_s7 }
  0x62   : > { %p2158_p12 = pnand %p2156_p11, %p2746_p8 }
  0x64   : > { %p2159_p13 = pneg %p2158_p12 }
  0x66   : > { %p2164_p2 = pnand %p2162_p0, %p2159_p13 }
  0x68   : > { %2167 = shalt.err (!%p2164_p2)
}
  0x69   : > { %s2168_s3 = scalar_lea.vmem %s437_s22, 16  ;;  %s2175_s20 = scalar_lea.vmem %s437_s22, 32 }
  0x6a   : > { %p2169_p4 = scmp.ne.s32.totalorder %s437_s22, %s2168_s3  ;;  %p2176_p5 = scmp.lt.s32.totalorder %s437_s22, %s437_s22 }
  0x6b   : > { %p2177_p10 = scmp.lt.s32.totalorder %s2175_s20, %s2168_s3 }
  0x6c   : > { %p2171_p7 = pnand %p2169_p4, %p2746_p8 }
  0x6d   : > { %p2178_p1 = por %p2177_p10, %p2176_p5 }
  0x6e   : > { %p2172_p9 = pneg %p2171_p7 }
  0x70   : > { %p2179_p3 = pnand %p2178_p1, %p2172_p9 }
  0x72   : > { %2182 = shalt.err (!%p2179_p3)
}
  0x73   : > { %1951 = dma.hbm_to_vmem [thread:$0]  (!%p2730_p6), %s3393_s7, 16, %s437_s22, [#allocation15]  }
  0x74   : > { %s2594_s12 = smov [#allocation17]   ;;  %s3394_s9 = sld [smem:[#allocation50_spill]] }
  0x75   : > { %s460_s24 = sshll.u32 %s2594_s12, 4  ;;  %s461_s24 = int_to_ptr.vmem [resolvable:$true] %s460_s24 }
  0x7a   : > { %s2183_s21 = scalar_lea.hbm %s3394_s9, 16 }
  0x7b   : > { %p2184_p11 = scmp.ne.s32.totalorder %s3394_s9, %s2183_s21  ;;  %p2190_p12 = scmp.lt.u32.totalorder %s2183_s21, %s3394_s9 }
  0x7d   : > { %p2186_p1 = pnand %p2184_p11, %p2746_p8 }
  0x7f   : > { %p2187_p3 = pneg %p2186_p1 }
  0x81   : > { %p2192_p13 = pnand %p2190_p12, %p2187_p3 }
  0x83   : > { %2195 = shalt.err (!%p2192_p13)
}
  0x84   : > { %s2196_s22 = scalar_lea.vmem %s461_s24, 16  ;;  %s2203_s2 = scalar_lea.vmem %s461_s24, 32 }
  0x85   : > { %p2197_p0 = scmp.ne.s32.totalorder %s461_s24, %s2196_s22  ;;  %p2204_p7 = scmp.lt.s32.totalorder %s461_s24, %s461_s24 }
  0x86   : > { %p2205_p9 = scmp.lt.s32.totalorder %s2203_s2, %s2196_s22 }
  0x87   : > { %p2199_p2 = pnand %p2197_p0, %p2746_p8 }
  0x88   : > { %p2206_p5 = por %p2205_p9, %p2204_p7 }
  0x89   : > { %p2200_p4 = pneg %p2199_p2 }
  0x8b   : > { %p2207_p10 = pnand %p2206_p5, %p2200_p4 }
  0x8d   : > { %2210 = shalt.err (!%p2207_p10)
}
  0x8e   : > { %1957 = dma.hbm_to_vmem [thread:$0]  (!%p2730_p6), %s3394_s9, 16, %s461_s24, [#allocation18]  }
  0x8f   : > { %s1728_s16 = sadd.s32 4294967294, %s2587_s30   ;;  %s51_s19 = sadd.s32 1, %s2583_s29 }
  0x90   : > { %p53_p11 = scmp.ge.s32.totalorder %s51_s19, 2  ;;  %s60_s21 = sadd.s32 1, %s2575_s27 }
  0x91   : > { %p67_p1 = scmp.ne.s32.totalorder %s2575_s27, %s2571_s26  ;;  %p68_p3 = scmp.eq.s32.totalorder %s2587_s30, 0 }
  0x92   : > { %s3454_s19 = smov (%p53_p11, %s51_s19), 0  ;;  %p73_p13 = scmp.ne.s32.totalorder %s2571_s26, %s2567_s25 }
  0x93   : > { %3395 = sst [smem:[#allocation38_spill]] %s3454_s19  ;;  %p2839_p12 = por %p68_p3, %p67_p1 }
  0x94   : > { %s55_s24 = ssub.s32 %s2583_s29, %s3454_s19  ;;  %p375_p0 = scmp.eq.s32.totalorder %s2714_s14, 1 }
  0x95   : > { %p58_p2 = scmp.eq.s32.totalorder %s55_s24, 0  ;;  %p3397_p4 = scmp.eq.s32.totalorder %s2714_s14, 0 }
  0x96   : > { %p2854_p9 = por %p375_p0, %p67_p1  ;;  %p381_p5 = scmp.eq.s32.totalorder %s1728_s16, 1 }
  0x97   : > { %p2850_p7 = por %p3397_p4, %p73_p13  ;;  %p1992_p11 = scmp.lt.s32.totalorder %s2587_s30, 2 }
  0x98   : > { %s3399_s3 = scalar_select %p2854_p9, 1, 0 }
  0x99   : > { %s3398_s17 = scalar_select %p2850_p7, 1, 0 }
  0x9a   : > { %3400 = sst [smem:[#allocation39_spill]] %s3399_s3  ;;  %p2861_p10 = por %p381_p5, %p73_p13 }
  0x9b   : > { %s2859_s20 = scalar_select %p58_p2, %s2575_s27, %s60_s21  }
  0x9c   : > { %s3402_s22 = scalar_select %p2861_p10, 1, 0 }
  0x9d   : > { %3401 = sst [smem:[#allocation40_spill]] %s2859_s20  ;;  %s2867_s2 = sand.u32 1, %s2587_s30  }
  0x9e   : > { %3403 = sst [smem:[#allocation41_spill]] %s3402_s22  ;;  %s3352_s11 = sand.u32 1, %s2575_s27  }
  0x9f   : > { %s2872_s12 = sshll.u32 %s3352_s11, 2  ;;  %s2875_s24 = sshll.u32 %s2583_s29, 6 }
  0xa0   : > { %s3404_s0 = sld [smem:[#allocation42_spill]]  ;;  %s499_s23 = scalar_lea.vmem [#allocation2], %s2872_s12 }
  0xa1   : > { %s507_s4 = sshll.u32 %s499_s23, 4  ;;  %p2888_p1 = pnand %p1992_p11, %p2839_p12  ;;  %s2884_s4 = int_to_ptr.vmem [resolvable:$true] %s507_s4 }
  0xa2   : > { %s3406_s1 = sld [smem:[#allocation43_spill]] }
  0xa3   : > { %s3405_s11 = scalar_select %p2888_p1, 1, 0 }
  0xa4   : > { %p2903_p13 = pneg %p2888_p1 }
  0xa6   : > { %s2881_s21 = scalar_lea.hbm %s3404_s0, %s2875_s24  ;;  %s2216_s20 = scalar_lea.hbm %s3404_s0, 128 }
  0xa7   : > { %s2211_s9 = scalar_lea.hbm %s2881_s21, 64  ;;  %p2217_p2 = scmp.lt.u32.totalorder %s2881_s21, %s3404_s0 }
  0xa8   : > { %s2896_s28 = scalar_lea.hbm %s3406_s1, %s2875_s24  ;;  %p2212_p3 = scmp.ne.s32.totalorder %s2881_s21, %s2211_s9 }
  0xa9   : > { %s3407_s19 = scalar_select %p2903_p13, 1, 0 }
  0xaa   : > { %p2214_p12 = pnand %p2903_p13, %p2212_p3  ;;  %p2218_p4 = scmp.lt.u32.totalorder %s2216_s20, %s2211_s9 }
  0xab   : > { %p2220_p11 = scmp.lt.u32.totalorder %s2211_s9, %s2881_s21 }
  0xac   : > { %p2215_p0 = pneg %p2214_p12  ;;  %p2219_p5 = por %p2218_p4, %p2217_p2 }
  0xae   : > { %p2221_p10 = por %p2220_p11, %p2219_p5 }
  0xb0   : > { %p2222_p9 = pnand %p2221_p10, %p2215_p0 }
  0xb2   : > { %2225 = shalt.err (!%p2222_p9)
}
  0xb3   : > { %s2226_s16 = scalar_lea.vmem %s2884_s4, 64  ;;  %s2595_s23 = smov [#allocation2]  }
  0xb4   : > { %p2227_p3 = scmp.ne.s32.totalorder %s2884_s4, %s2226_s16  ;;  %s2231_s13 = sshll.u32 %s2595_s23, 4  ;;  %s2232_s13 = int_to_ptr.vmem [resolvable:$false] %s2231_s13 }
  0xb5   : > { %s2233_s5 = scalar_lea.vmem %s2232_s13, 128  ;;  %p2234_p6 = scmp.lt.s32.totalorder %s2884_s4, %s2232_s13 }
  0xb6   : > { %p2229_p12 = pnand %p2227_p3, %p2903_p13  ;;  %p2235_p8 = scmp.lt.s32.totalorder %s2233_s5, %s2226_s16 }
  0xb8   : > { %p2230_p7 = pneg %p2229_p12  ;;  %p2236_p2 = por %p2235_p8, %p2234_p6 }
  0xba   : > { %p2237_p4 = pnand %p2236_p2, %p2230_p7 }
  0xbc   : > { %2240 = shalt.err (!%p2237_p4)
}
  0xbd   : > { %s3408_s9 = scalar_lea.sflag [#allocation3], %s2867_s2  ;;  %s518_s20 = scalar_lea.vmem [#allocation5], %s2872_s12 }
  0xbe   : > { %1967 = dma.hbm_to_vmem [thread:$0]  (!%p2888_p1), %s2881_s21, 64, %s2884_s4, %s3408_s9  }
  0xbf   : > { %s525_s7 = sshll.u32 %s518_s20, 4  ;;  %s2596_s16 = smov [#allocation13]   ;;  %s2929_s7 = int_to_ptr.vmem [resolvable:$true] %s525_s7 }
  0xc0   : > { %s2931_s23 = sshll.u32 %s2596_s16, 4  ;;  %s3370_s13 = scalar_lea.sflag [#allocation6], %s2867_s2  ;;  %s426_s23 = int_to_ptr.vmem [resolvable:$true] %s2931_s23 }
  0xc1   : > { %s2241_s5 = scalar_lea.hbm %s2896_s28, 64  ;;  %s2246_s22 = scalar_lea.hbm %s3406_s1, 128 }
  0xc2   : > { %p2242_p6 = scmp.ne.s32.totalorder %s2896_s28, %s2241_s5  ;;  %p2247_p9 = scmp.lt.u32.totalorder %s2896_s28, %s3406_s1 }
  0xc3   : > { %p2248_p10 = scmp.lt.u32.totalorder %s2246_s22, %s2241_s5  ;;  %p2250_p5 = scmp.lt.u32.totalorder %s2241_s5, %s2896_s28 }
  0xc4   : > { %p2244_p8 = pnand %p2242_p6, %p2903_p13 }
  0xc5   : > { %p2249_p0 = por %p2248_p10, %p2247_p9 }
  0xc6   : > { %p2245_p7 = pneg %p2244_p8 }
  0xc7   : > { %p2251_p11 = por %p2250_p5, %p2249_p0 }
  0xc9   : > { %p2252_p3 = pnand %p2251_p11, %p2245_p7 }
  0xcb   : > { %2255 = shalt.err (!%p2252_p3)
}
  0xcc   : > { %s2256_s4 = scalar_lea.vmem %s2929_s7, 64  ;;  %s2597_s0 = smov [#allocation5]  }
  0xcd   : > { %p2257_p12 = scmp.ne.s32.totalorder %s2929_s7, %s2256_s4  ;;  %s2261_s30 = sshll.u32 %s2597_s0, 4  ;;  %s2262_s30 = int_to_ptr.vmem [resolvable:$false] %s2261_s30 }
  0xce   : > { %s2263_s25 = scalar_lea.vmem %s2262_s30, 128  ;;  %p2264_p6 = scmp.lt.s32.totalorder %s2929_s7, %s2262_s30 }
  0xcf   : > { %p2259_p2 = pnand %p2257_p12, %p2903_p13  ;;  %p2265_p8 = scmp.lt.s32.totalorder %s2263_s25, %s2256_s4 }
  0xd1   : > { %p2260_p4 = pneg %p2259_p2  ;;  %p2266_p9 = por %p2265_p8, %p2264_p6 }
  0xd3   : > { %p2267_p10 = pnand %p2266_p9, %p2260_p4 }
  0xd5   : > { %2270 = shalt.err (!%p2267_p10)
}
  0xd6   : > { %1970 = dma.hbm_to_vmem [thread:$0]  (!%p2888_p1), %s2896_s28, 64, %s2929_s7, %s3370_s13  }
  0xd7   : > { %s3409_s6 = sld [smem:[#allocation48_spill]]  ;;  %p3410_p0 = scmp.ne.s32.totalorder %s3391_s15, 0 }
  0xdd   : > { %s2271_s21 = scalar_lea.hbm %s3409_s6, 16 }
  0xde   : > { %p2272_p7 = scmp.ne.s32.totalorder %s3409_s6, %s2271_s21  ;;  %p2278_p3 = scmp.lt.u32.totalorder %s2271_s21, %s3409_s6 }
  0xe0   : > { %p2274_p5 = pnand %p2272_p7, %p3410_p0 }
  0xe2   : > { %p2275_p11 = pneg %p2274_p5 }
  0xe4   : > { %p2280_p12 = pnand %p2278_p3, %p2275_p11 }
  0xe6   : > { %2283 = shalt.err (!%p2280_p12)
}
  0xe7   : > { %s2284_s4 = scalar_lea.vmem %s426_s23, 16  ;;  %s2291_s28 = scalar_lea.vmem %s426_s23, 32 }
  0xe8   : > { %p2285_p2 = scmp.ne.s32.totalorder %s426_s23, %s2284_s4  ;;  %p2292_p8 = scmp.lt.s32.totalorder %s426_s23, %s426_s23 }
  0xe9   : > { %p2293_p9 = scmp.lt.s32.totalorder %s2291_s28, %s2284_s4 }
  0xea   : > { %p2287_p4 = pnand %p2285_p2, %p3410_p0 }
  0xeb   : > { %p2294_p10 = por %p2293_p9, %p2292_p8 }
  0xec   : > { %p2288_p6 = pneg %p2287_p4 }
  0xee   : > { %p2295_p1 = pnand %p2294_p10, %p2288_p6 }
  0xf0   : > { %2298 = shalt.err (!%p2295_p1)
}
  0xf1   : > { %p3411_p7 = scmp.ne.s32.totalorder %s3389_s18, 0  ;;  %s2598_s30 = smov [#allocation16]  }
  0xf2   : > { %s446_s25 = sshll.u32 %s2598_s30, 4  ;;  %s2599_s3 = smov [#allocation19]   ;;  %s447_s25 = int_to_ptr.vmem [resolvable:$true] %s446_s25 }
  0xf3   : > { %1948 = dma.hbm_to_vmem [thread:$0]  (!%p3411_p7), %s3409_s6, 16, %s426_s23, [#allocation12]  }
  0xf4   : > { %s470_s22 = sshll.u32 %s2599_s3, 4  ;;  %s2299_s20 = scalar_lea.hbm %s3334_s8, 256  ;;  %s471_s22 = int_to_ptr.vmem [resolvable:$true] %s470_s22 }
  0xf5   : > { %p2300_p1 = scmp.ne.s32.totalorder %s3334_s8, %s2299_s20  ;;  %p2306_p3 = scmp.lt.u32.totalorder %s2299_s20, %s3334_s8 }
  0xf7   : > { %p2302_p5 = pnand %p2300_p1, %p3410_p0 }
  0xf9   : > { %p2303_p11 = pneg %p2302_p5 }
  0xfb   : > { %p2308_p12 = pnand %p2306_p3, %p2303_p11 }
  0xfd   : > { %2311 = shalt.err (!%p2308_p12)
}
  0xfe   : > { %s2312_s23 = scalar_lea.vmem %s447_s25, 256  ;;  %p2320_p8 = scmp.lt.s32.totalorder %s447_s25, %s447_s25 }
  0xff   : > { %p2313_p2 = scmp.ne.s32.totalorder %s447_s25, %s2312_s23  ;;  %p2321_p9 = scmp.lt.s32.totalorder %s2312_s23, %s2312_s23 }
 0x101   : > { %p2315_p4 = pnand %p2313_p2, %p3410_p0  ;;  %p2322_p10 = por %p2321_p9, %p2320_p8 }
 0x103   : > { %p2316_p6 = pneg %p2315_p4 }
 0x105   : > { %p2323_p13 = pnand %p2322_p10, %p2316_p6 }
 0x107   : > { %2326 = shalt.err (!%p2323_p13)
}
 0x108   : > { %s3412_s7 = smov 4   ;;  %s3413_s0 = smov 64  }
 0x109   : > { %1954 = dma.hbm_to_vmem [thread:$0]  (!%p3411_p7), %s3334_s8, 256, %s447_s25, [#allocation15], %s3413_s0, %s3413_s0, %s3412_s7  }
 0x10a   : > { %s2327_s20 = scalar_lea.hbm %s3336_s10, 512 }
 0x10b   : > { %p2328_p1 = scmp.ne.s32.totalorder %s3336_s10, %s2327_s20  ;;  %p2334_p11 = scmp.lt.u32.totalorder %s2327_s20, %s3336_s10 }
 0x10d   : > { %p2330_p13 = pnand %p2328_p1, %p3410_p0 }
 0x10f   : > { %p2331_p5 = pneg %p2330_p13 }
 0x111   : > { %p2336_p3 = pnand %p2334_p11, %p2331_p5 }
 0x113   : > { %2339 = shalt.err (!%p2336_p3)
}
 0x114   : > { %s2340_s23 = scalar_lea.vmem %s471_s22, 512  ;;  %p2348_p6 = scmp.lt.s32.totalorder %s471_s22, %s471_s22 }
 0x115   : > { %p2341_p12 = scmp.ne.s32.totalorder %s471_s22, %s2340_s23  ;;  %p2349_p8 = scmp.lt.s32.totalorder %s2340_s23, %s2340_s23 }
 0x117   : > { %p2343_p2 = pnand %p2341_p12, %p3410_p0  ;;  %p2350_p9 = por %p2349_p8, %p2348_p6 }
 0x119   : > { %p2344_p4 = pneg %p2343_p2 }
 0x11b   : > { %p2351_p10 = pnand %p2350_p9, %p2344_p4 }
 0x11d   : > { %2354 = shalt.err (!%p2351_p10)
}
 0x11e   : > { %1960 = dma.hbm_to_vmem [thread:$0]  (!%p3411_p7), %s3336_s10, 512, %s471_s22, [#allocation18], %s3413_s0, %s3413_s0, %s3412_s7  }
 0x11f   : > { %s2600_s3 = smov [#allocation20]   ;;  %s3414_s16 = sld [smem:[#allocation44_spill]] }
 0x120   : > { %s484_s21 = sshll.u32 %s2600_s3, 4  ;;  %s3415_s23 = sld [smem:[#allocation51_spill]]  ;;  %s485_s21 = int_to_ptr.vmem [resolvable:$true] %s484_s21 }
 0x125   : > { %s3022_s5 = scalar_lea.hbm %s3414_s16, %s2875_s24 }
 0x126   : > { %s2355_s13 = scalar_lea.hbm %s3415_s23, 16 }
 0x127   : > { %p2356_p1 = scmp.ne.s32.totalorder %s3415_s23, %s2355_s13  ;;  %p2362_p11 = scmp.lt.u32.totalorder %s2355_s13, %s3415_s23 }
 0x129   : > { %p2358_p13 = pnand %p2356_p1, %p3410_p0 }
 0x12b   : > { %p2359_p5 = pneg %p2358_p13 }
 0x12d   : > { %p2364_p3 = pnand %p2362_p11, %p2359_p5 }
 0x12f   : > { %2367 = shalt.err (!%p2364_p3)
}
 0x130   : > { %s2368_s0 = scalar_lea.vmem %s485_s21, 16  ;;  %s2375_s25 = scalar_lea.vmem %s485_s21, 32 }
 0x131   : > { %p2369_p12 = scmp.ne.s32.totalorder %s485_s21, %s2368_s0  ;;  %p2376_p6 = scmp.lt.s32.totalorder %s485_s21, %s485_s21 }
 0x132   : > { %p2377_p8 = scmp.lt.s32.totalorder %s2375_s25, %s2368_s0 }
 0x133   : > { %p2371_p2 = pnand %p2369_p12, %p3410_p0 }
 0x134   : > { %p2378_p9 = por %p2377_p8, %p2376_p6 }
 0x135   : > { %p2372_p4 = pneg %p2371_p2 }
 0x137   : > { %p2379_p10 = pnand %p2378_p9, %p2372_p4 }
 0x139   : > { %2382 = shalt.err (!%p2379_p10)
}
 0x13a   : > { %1963 = dma.hbm_to_vmem [thread:$0]  (!%p3411_p7), %s3415_s23, 16, %s485_s21, [#allocation21]  }
 0x13b   : > { %s536_s15 = scalar_lea.vmem [#allocation7], %s2872_s12  ;;  %s2383_s30 = scalar_lea.hbm %s3022_s5, 64 }
 0x13c   : > { %s543_s13 = sshll.u32 %s536_s15, 4  ;;  %p2384_p0 = scmp.ne.s32.totalorder %s3022_s5, %s2383_s30  ;;  %s544_s13 = int_to_ptr.vmem [resolvable:$true] %s543_s13 }
 0x13d   : > { %p3416_p1 = scmp.ne.s32.totalorder %s3407_s19, 0  ;;  %s2388_s9 = scalar_lea.hbm %s3414_s16, 128 }
 0x13e   : > { %p2389_p11 = scmp.lt.u32.totalorder %s3022_s5, %s3414_s16  ;;  %p2390_p3 = scmp.lt.u32.totalorder %s2388_s9, %s2383_s30 }
 0x13f   : > { %p2386_p13 = pnand %p2384_p0, %p3416_p1  ;;  %p2392_p2 = scmp.lt.u32.totalorder %s2383_s30, %s3022_s5 }
 0x140   : > { %p2391_p12 = por %p2390_p3, %p2389_p11 }
 0x141   : > { %p2387_p5 = pneg %p2386_p13 }
 0x142   : > { %p2393_p7 = por %p2392_p2, %p2391_p12 }
 0x144   : > { %p2394_p4 = pnand %p2393_p7, %p2387_p5 }
 0x146   : > { %2397 = shalt.err (!%p2394_p4)
}
 0x147   : > { %s2398_s21 = scalar_lea.vmem %s544_s13, 64  ;;  %s2601_s28 = smov [#allocation7]  }
 0x148   : > { %p2399_p6 = scmp.ne.s32.totalorder %s544_s13, %s2398_s21  ;;  %s2403_s22 = sshll.u32 %s2601_s28, 4  ;;  %s2404_s22 = int_to_ptr.vmem [resolvable:$false] %s2403_s22 }
 0x149   : > { %s2405_s7 = scalar_lea.vmem %s2404_s22, 128  ;;  %p2406_p10 = scmp.lt.s32.totalorder %s544_s13, %s2404_s22 }
 0x14a   : > { %p2401_p8 = pnand %p2399_p6, %p3416_p1  ;;  %p2407_p0 = scmp.lt.s32.totalorder %s2405_s7, %s2398_s21 }
 0x14c   : > { %p2402_p9 = pneg %p2401_p8  ;;  %p2408_p13 = por %p2407_p0, %p2406_p10 }
 0x14e   : > { %p2409_p3 = pnand %p2408_p13, %p2402_p9 }
 0x150   : > { %2412 = shalt.err (!%p2409_p3)
}
 0x151   : > { %p3417_p11 = scmp.ne.s32.totalorder %s3405_s11, 0  ;;  %s3418_s0 = scalar_lea.sflag [#allocation6], %s2867_s2 }
 0x152   : > { %s3419_s6 = sld [smem:[#allocation45_spill]]  ;;  %s554_s30 = scalar_lea.vmem [#allocation8], %s2872_s12 }
 0x153   : > { %1973 = dma.hbm_to_vmem [thread:$0]  (!%p3417_p11), %s3022_s5, 64, %s544_s13, %s3418_s0  }
 0x154   : > { %s562_s3 = sshll.u32 %s554_s30, 4  ;;  %s3420_s18 = sand.u32 1, %s2575_s27   ;;  %s3069_s3 = int_to_ptr.vmem [resolvable:$true] %s562_s3 }
 0x155   : > { %s3073_s9 = sshll.u32 %s3420_s18, 3  ;;  %s551_s20 = scalar_lea.sflag [#allocation9], %s2867_s2 }
 0x158   : > { %s3066_s15 = scalar_lea.hbm %s3419_s6, %s2875_s24  ;;  %s2418_s13 = scalar_lea.hbm %s3419_s6, 128 }
 0x159   : > { %s2413_s4 = scalar_lea.hbm %s3066_s15, 64  ;;  %p2419_p7 = scmp.lt.u32.totalorder %s3066_s15, %s3419_s6 }
 0x15a   : > { %p2414_p5 = scmp.ne.s32.totalorder %s3066_s15, %s2413_s4  ;;  %p2420_p4 = scmp.lt.u32.totalorder %s2418_s13, %s2413_s4 }
 0x15b   : > { %p2422_p8 = scmp.lt.u32.totalorder %s2413_s4, %s3066_s15 }
 0x15c   : > { %p2416_p12 = pnand %p2414_p5, %p3416_p1  ;;  %p2421_p6 = por %p2420_p4, %p2419_p7 }
 0x15e   : > { %p2417_p2 = pneg %p2416_p12  ;;  %p2423_p9 = por %p2422_p8, %p2421_p6 }
 0x160   : > { %p2424_p10 = pnand %p2423_p9, %p2417_p2 }
 0x162   : > { %2427 = shalt.err (!%p2424_p10)
}
 0x163   : > { %s2428_s12 = scalar_lea.vmem %s3069_s3, 64  ;;  %s2602_s22 = smov [#allocation8]  }
 0x164   : > { %p2429_p0 = scmp.ne.s32.totalorder %s3069_s3, %s2428_s12  ;;  %s2433_s7 = sshll.u32 %s2602_s22, 4  ;;  %s2434_s7 = int_to_ptr.vmem [resolvable:$false] %s2433_s7 }
 0x165   : > { %s2435_s0 = scalar_lea.vmem %s2434_s7, 128  ;;  %p2436_p5 = scmp.lt.s32.totalorder %s3069_s3, %s2434_s7 }
 0x166   : > { %p2431_p13 = pnand %p2429_p0, %p3416_p1  ;;  %p2437_p12 = scmp.lt.s32.totalorder %s2435_s0, %s2428_s12 }
 0x168   : > { %p2432_p3 = pneg %p2431_p13  ;;  %p2438_p7 = por %p2437_p12, %p2436_p5 }
 0x16a   : > { %p2439_p4 = pnand %p2438_p7, %p2432_p3 }
 0x16c   : > { %2442 = shalt.err (!%p2439_p4)
}
 0x16d   : > { %1976 = dma.hbm_to_vmem [thread:$0]  (!%p3417_p11), %s3066_s15, 64, %s3069_s3, %s551_s20  }
 0x16e   : > { %s1748_s25 = sshll.u32 %s2583_s29, 7  ;;  %s3421_s18 = sld [smem:[#allocation52_spill]] }
 0x16f   : > { %s573_s5 = scalar_lea.vmem [#allocation22], %s3073_s9 }
 0x170   : > { %s581_s24 = sshll.u32 %s573_s5, 4  ;;  %s582_s24 = int_to_ptr.vmem [resolvable:$true] %s581_s24 }
 0x174   : > { %s3101_s4 = scalar_lea.hbm %s3421_s18, %s1748_s25  ;;  %s2448_s3 = scalar_lea.hbm %s3421_s18, 256 }
 0x175   : > { %s2443_s13 = scalar_lea.hbm %s3101_s4, 128  ;;  %p2449_p9 = scmp.lt.u32.totalorder %s3101_s4, %s3421_s18 }
 0x176   : > { %p2444_p2 = scmp.ne.s32.totalorder %s3101_s4, %s2443_s13  ;;  %p2450_p10 = scmp.lt.u32.totalorder %s2448_s3, %s2443_s13 }
 0x177   : > { %p2452_p13 = scmp.lt.u32.totalorder %s2443_s13, %s3101_s4 }
 0x178   : > { %p2446_p6 = pnand %p2444_p2, %p3416_p1  ;;  %p2451_p0 = por %p2450_p10, %p2449_p9 }
 0x17a   : > { %p2447_p8 = pneg %p2446_p6  ;;  %p2453_p3 = por %p2452_p13, %p2451_p0 }
 0x17c   : > { %p2454_p5 = pnand %p2453_p3, %p2447_p8 }
 0x17e   : > { %2457 = shalt.err (!%p2454_p5)
}
 0x17f   : > { %s2458_s9 = scalar_lea.vmem %s582_s24, 128  ;;  %s2603_s12 = smov [#allocation22]  }
 0x180   : > { %p2459_p12 = scmp.ne.s32.totalorder %s582_s24, %s2458_s9  ;;  %s2463_s22 = sshll.u32 %s2603_s12, 4  ;;  %s2464_s22 = int_to_ptr.vmem [resolvable:$false] %s2463_s22 }
 0x181   : > { %s2465_s7 = scalar_lea.vmem %s2464_s22, 256  ;;  %p2466_p2 = scmp.lt.s32.totalorder %s582_s24, %s2464_s22 }
 0x182   : > { %p2461_p7 = pnand %p2459_p12, %p3416_p1  ;;  %p2467_p6 = scmp.lt.s32.totalorder %s2465_s7, %s2458_s9 }
 0x184   : > { %p2462_p4 = pneg %p2461_p7  ;;  %p2468_p11 = por %p2467_p6, %p2466_p2 }
 0x186   : > { %p2469_p9 = pnand %p2468_p11, %p2462_p4 }
 0x188   : > { %2472 = shalt.err (!%p2469_p9)
}
 0x189   : > { %p3422_p10 = scmp.ne.s32.totalorder %s3405_s11, 0  ;;  %s3423_s0 = scalar_lea.sflag [#allocation3], %s2867_s2 }
 0x18a   : > { %s3424_s25 = sld [smem:[#allocation37_spill]] }
 0x18b   : > { %1979 = dma.hbm_to_vmem [thread:$0]  (!%p3422_p10), %s3101_s4, 128, %s582_s24, %s3423_s0  }
 0x190   : > { %p3425_p8 = scmp.ne.s32.totalorder %s3424_s25, 0 }
 0x191   : > { %s592_s19 = sand.u32 (!%p3425_p8), 1, %s2714_s14   ;;  %s3127_s1 = sand.u32 (!%p3425_p8), 1, %s2571_s26  }
 0x192   : > { %590 = sbr.rel (%p3425_p8) target bundleno = 2436 (0x984), region = 72  ;;  %s3130_s30 = sshll.u32 (!%p3425_p8), %s3127_s1, 2 }
 0x193   : > { %s593_s5 = scalar_lea.sflag (!%p3425_p8), [#allocation3], %s592_s19  ;;  %s596_s13 = scalar_lea.vmem (!%p3425_p8), [#allocation2], %s3130_s30 }
 0x194   : > { %p3426_p1 = scmp.ne.s32.totalorder (!%p3425_p8), %s3398_s17, 0 }
 0x199   : > { %2526 = dma.done.wait (%p3426_p1), %s593_s5, 64  }
 0x19a   : > { %2528 = vsyncadd (%p3426_p1), %s593_s5, 4294967232  ;;  %s602_s2 = scalar_lea.sflag [#allocation6], %s592_s19  ;;  %s605_s11 = scalar_lea.vmem [#allocation5], %s3130_s30 }
 0x19b   : > { %2530 = dma.done.wait (%p3426_p1), %s602_s2, 128  }
 0x19c   : > { %2532 = vsyncadd (%p3426_p1), %s602_s2, 4294967168  ;;  %s614_s4 = scalar_lea.vmem [#allocation7], %s3130_s30  ;;  %s620_s24 = scalar_lea.sflag [#allocation9], %s592_s19 }
 0x19d   : > { %s623_s21 = scalar_lea.vmem [#allocation8], %s3130_s30 }
 0x19e   : > { %2534 = dma.done.wait (%p3426_p1), %s620_s24, 64  }
 0x19f   : > { %2536 = vsyncadd (%p3426_p1), %s620_s24, 4294967232  ;;  %p3427_p11 = scmp.eq.s32.totalorder %s2714_s14, 0 }
 0x1a1   : > { %2538 = dma.done.wait (%p3427_p11), [#allocation9], 256   ;;  %p3428_p0 = pmov %p3427_p11 }
 0x1a3   : > { %2540 = vsyncadd (%p3428_p0), [#allocation9], 4294967040  ;;  %p3429_p13 = pmov %p3428_p0 }
 0x1a4   : > { %p3430_p3 = pmov %p3428_p0 }
 0x1a5   : > { %2542 = dma.done.wait (%p3429_p13), [#allocation12], 32  }
 0x1a6   : > { %2544 = vsyncadd (%p3430_p3), [#allocation12], 4294967264  ;;  %p3431_p5 = pmov %p3428_p0 }
 0x1a7   : > { %p3432_p12 = pmov %p3428_p0 }
 0x1a8   : > { %2546 = dma.done.wait (%p3431_p5), [#allocation15], 272  }
 0x1a9   : > { %2548 = vsyncadd (%p3432_p12), [#allocation15], 4294967024  ;;  %p3433_p7 = pmov %p3428_p0 }
 0x1aa   : > { %p3434_p4 = pmov %p3428_p0 }
 0x1ab   : > { %2550 = dma.done.wait (%p3433_p7), [#allocation18], 528  }
 0x1ac   : > { %2552 = vsyncadd (%p3434_p4), [#allocation18], 4294966768  ;;  %p3435_p2 = pmov %p3428_p0 }
 0x1ad   : > { %p3436_p6 = pmov %p3428_p0 }
 0x1ae   : > { %2554 = dma.done.wait (%p3435_p2), [#allocation21], 16  }
 0x1af   : > { %2556 = vsyncadd (%p3436_p6), [#allocation21], 4294967280  ;;  %s1762_s15 = sshll.u32 %s3127_s1, 3 }
 0x1b0   : > { %s3171_s3 = scalar_lea.vmem [#allocation22], %s1762_s15 }
 0x1b1   : > { %2558 = dma.done.wait (%p3426_p1), %s593_s5, 128  }
 0x1b2   : > { %2560 = vsyncadd (%p3426_p1), %s593_s5, 4294967168  ;;  %v2604_v0 = vmov 0.0   ;;  %vm2605_vm0 = vmmov 0   ;;  %vm733_vm1 = vcmask 64512   ;;  %v729_v1 = vld [vmem:[%s605_s11] sm:$0xf] }
 0x1b3   : > { %1819 = vmatprep.subr.bf16.mxu0 %v2604_v0  ;;  %1821 = vmatprep.mubr.msk.bf16.mxu0 %vm2605_vm0, %v2604_v0  ;;  %v728_v2 = vld [vmem:[%s596_s13] sm:$0xf]  ;;  %v738_v3 = vsel %vm733_vm1, %v729_v1, 0  ;;  %v1767_v4 = vcombine.low %v729_v1, %v729_v1  ;;  %s2606_s14 = smov 120   ;;  %s2607_s17 = smov 112   ;;  %vm798_vm2 = vcmask 1043456  }
 0x1b4   : > { %1831 = vmatprep.subr.bf16.mxu1 %v2604_v0  ;;  %1833 = vmatprep.mubr.msk.bf16.mxu1 %vm2605_vm0, %v2604_v0  ;;  %v1766_v5 = vcombine.low %v728_v2, %v728_v2  ;;  %s2608_s20 = smov 104   ;;  %v731_v15 = vld [vmem:[%s623_s21] sm:$0xf]  ;;  %v730_v48 = vld [vmem:[%s614_s4] sm:$0xf]  ;;  %s2609_s28 = smov 8  }
 0x1b5   : > { %1820 = vmatpush3.bf16.xpose.msra.mxu0 %v738_v3  ;;  %851 = vrot.lane.b32.xlu0 %v1767_v4, %s2606_s14  ;;  %v732_v16 = vunpack.c.l.bf16 %v731_v15  ;;  %v1769_v49 = vcombine.low %v730_v48, %v730_v48  ;;  %v800_v50 = vsel %vm798_vm2, %v730_v48, 0  ;;  %s2610_s9 = smov 16   ;;  %s2611_s12 = smov 24   ;;  %vm1206_vm3 = vcmask 130048  }
 0x1b6   : > { %968 = vrot.lane.b32.xlu1 %v1767_v4, %s2607_s17  ;;  %1825 = vmatprep.subr.bf16.mxu0 %v2604_v0  ;;  %vm1209_vm4 = vcmask 195584   ;;  %vm1234_vm5 = vcmask 261120   ;;  %s3437_s22 = sld [smem:[#allocation35_spill]]  ;;  %vm1422_vm8 = vcmask 523264   ;;  %s3438_s7 = sld [smem:[#allocation39_spill]] }
 0x1b7   : > { %s726_s25 = scalar_lea.vmem [#allocation23], %s1762_s15  ;;  %s3439_s13 = sld [smem:[#allocation53_spill]] }
 0x1b8   : > { %s1483_s19 = sshll.u32 %s726_s25, 4  ;;  %s1469_s11 = scalar_lea.sflag [#allocation4], %s3127_s1  ;;  %s3278_s19 = int_to_ptr.vmem [resolvable:$true] %s1483_s19 }
 0x1b9   : > { %846 = vrot.lane.b32.xlu0 %v1766_v5, %s2606_s14  ;;  %s2473_s4 = scalar_lea.vmem %s3278_s19, 128  ;;  %s2612_s24 = smov [#allocation23]  }
 0x1ba   : > { %966 = vrot.lane.b32.xlu1 %v1766_v5, %s2607_s17  ;;  %p2474_p9 = scmp.ne.s32.totalorder %s3278_s19, %s2473_s4  ;;  %s2477_s21 = sshll.u32 %s2612_s24, 4  ;;  %s2478_s21 = int_to_ptr.vmem [resolvable:$false] %s2477_s21 }
 0x1bb   : > { %s2479_s15 = scalar_lea.vmem %s2478_s21, 256  ;;  %p2480_p11 = scmp.lt.s32.totalorder %s3278_s19, %s2478_s21 }
 0x1bc   : > { %1822 = vmatmul.mubr.msk.bf16.vlgmr.msra.gmra.mrb[0].mxu0 %vm733_vm1, %v728_v2  ;;  %s1789_s0 = sshll.u32 %s3437_s22, 7  ;;  %p3440_p10 = scmp.ne.s32.totalorder %s3438_s7, 0 }
 0x1bd   : > { %1827 = vmatprep.mubr.msk.bf16.mxu0 %vm2605_vm0, %v2604_v0  ;;  %1082 = vrot.lane.b32.xlu0 %v1767_v4, %s2608_s20  ;;  %s3276_s2 = scalar_lea.hbm %s3439_s13, %s1789_s0  ;;  %p2481_p0 = scmp.lt.s32.totalorder %s2479_s15, %s2473_s4 }
 0x1be   : > { %1080 = vrot.lane.b32.xlu1 %v1766_v5, %s2608_s20  ;;  %1826 = vmatpush3.bf16.msra.mxu0 %v800_v50  ;;  %p2475_p8 = pnand %p2474_p9, %p3440_p10 }
 0x1bf   : > { %1837 = vmatprep.subr.bf16.mxu0 %v2604_v0  ;;  %p2482_p13 = por %p2481_p0, %p2480_p11 }
 0x1c0   : > { %p2476_p1 = pneg %p2475_p8 }
 0x1c2   : > { %p2483_p3 = pnand %p2482_p13, %p2476_p1 }
 0x227   : > { %v852_v6 = vpop.permute.xlu0 %851 }
 0x228   : > { %v857_v7 = vsel %vm733_vm1, %v852_v6, 0  ;;  %v969_v8 = vpop.permute.xlu1 %968 }
 0x229   : > { %1832 = vmatpush3.bf16.xpose.msra.mxu1 %v857_v7  ;;  %v974_v10 = vsel %vm733_vm1, %v969_v8, 0 }
 0x22a   : > { %1843 = vmatprep.subr.bf16.mxu1 %v2604_v0 }
 0x22b   : > { %v847_v9 = vpop.permute.xlu0 %846 }
 0x22c   : > { %v967_v12 = vpop.permute.xlu1 %966 }
 0x22f   : > { %v1083_v11 = vpop.permute.xlu0 %1082 }
 0x230   : > { %1834 = vmatmul.mubr.msk.bf16.vlgmr.msra.gmra.mrb[0].mxu1 %vm733_vm1, %v847_v9  ;;  %v1088_v13 = vsel %vm733_vm1, %v1083_v11, 0  ;;  %v1081_v14 = vpop.permute.xlu1 %1080 }
 0x231   : > { %1844 = vmatpush3.bf16.xpose.msra.mxu1 %v974_v10  ;;  %1845 = vmatprep.mubr.msk.bf16.mxu1 %vm2605_vm0, %v2604_v0 }
 0x232   : > { %1855 = vmatprep.subr.bf16.mxu1 %v2604_v0 }
 0x238   : > { %1846 = vmatmul.mubr.msk.bf16.vlgmr.msra.gmra.mrb[4].mxu1 %vm733_vm1, %v967_v12 }
 0x239   : > { %1856 = vmatpush3.bf16.xpose.msra.mxu1 %v1088_v13  ;;  %1857 = vmatprep.mubr.msk.bf16.mxu1 %vm2605_vm0, %v2604_v0 }
 0x23a   : > { %1867 = vmatprep.subr.bf16.mxu1 %v2604_v0 }
 0x240   : > { %1858 = vmatmul.mubr.msk.bf16.vlgmr.msra.gmra.mrb[8].mxu1 %vm733_vm1, %v1081_v14 }
 0x241   : > { %1871 = vmatprep.mubr.msk.bf16.mxu1 %vm2605_vm0, %v2604_v0 }
 0x28f   : > { %v774_v17 = vpop.f32.mrb[0].mxu0 }
 0x290   : > { %v775_v18 = vadd.f32 %v774_v17, %v732_v16  ;;  %v1823_v19 = vpop.f32.mrb[1].mxu0 }
 0x291   : > { %v777_v20 = vpop.f32.mrb[2].mxu0 }
 0x292   : > { %v780_v21 = vsel %vm733_vm1, %v775_v18, -inf  ;;  %v1824_v22 = vpop.f32.mrb[3].mxu0 }
 0x293   : > { %781 = vmax.xlane.f32.xlu0 %v780_v21 }
 0x303   : > { %v893_v23 = vpop.f32.mrb[0].mxu1 }
 0x304   : > { %v894_v24 = vadd.f32 %v893_v23, %v732_v16  ;;  %v1835_v25 = vpop.f32.mrb[1].mxu1 }
 0x305   : > { %v896_v26 = vpop.f32.mrb[2].mxu1 }
 0x306   : > { %v1836_v27 = vpop.f32.mrb[3].mxu1  ;;  %v899_v28 = vsel %vm733_vm1, %v894_v24, -inf }
 0x307   : > { %900 = vmax.xlane.f32.xlu1 %v899_v28 }
 0x30b   : > { %v1010_v29 = vpop.f32.mrb[4].mxu1 }
 0x30c   : > { %v1011_v30 = vadd.f32 %v1010_v29, %v732_v16  ;;  %v1847_v31 = vpop.f32.mrb[5].mxu1 }
 0x30d   : > { %v1013_v32 = vpop.f32.mrb[6].mxu1 }
 0x30e   : > { %v1848_v33 = vpop.f32.mrb[7].mxu1  ;;  %v1016_v34 = vsel %vm733_vm1, %v1011_v30, -inf }
 0x30f   : > { %1017 = vmax.xlane.f32.xlu0 %v1016_v34 }
 0x313   : > { %v1124_v35 = vpop.f32.mrb[8].mxu1 }
 0x314   : > { %v1125_v36 = vadd.f32 %v1124_v35, %v732_v16  ;;  %v1859_v37 = vpop.f32.mrb[9].mxu1  ;;  %v2071_v35 = vld [vmem:[#allocation10] sm:$0xff]  }
 0x315   : > { %v1127_v38 = vpop.f32.mrb[10].mxu1  ;;  %1868 = vmatpush3.bf16.msra.mxu1 %v2071_v35  ;;  %v2078_v35 = vld [vmem:[#allocation19 + $0x18] sm:$0xff]  }
 0x316   : > { %v1860_v39 = vpop.f32.mrb[11].mxu1  ;;  %v1130_v40 = vsel %vm733_vm1, %v1125_v36, -inf  ;;  %1869 = vmatprep.subr.bf16.mxu1 %v2604_v0 }
 0x317   : > { %1131 = vmax.xlane.f32.xlu0 %v1130_v40  ;;  %v2072_v39 = vld [vmem:[#allocation10 + $0x8] sm:$0xff]  }
 0x319   : > { %1870 = vmatpush3.bf16.msra.mxu1 %v2072_v39 }
 0x31a   : > { %1883 = vmatprep.subr.bf16.mxu1 %v2604_v0 }
 0x320   : > { %v782_v41 = vpop.xlane.xlu0 %781 }
 0x321   : > { %v783_v42 = vsub.f32 %v775_v18, %v782_v41 }
 0x323   : > { %v784_v43 = vpack.c.bf16 %v783_v42, %v783_v42 }
 0x325   : > { %v786_v44 = vmul.bf16 1069105081, %v784_v43 }
 0x327   : > { %2079 = vpow.bf16 %v786_v44 }
 0x332   : > { %v2080_v45 = vpop.eup %2079 }
 0x333   : > { %v788_v46 = vunpack.c.l.bf16 %v2080_v45 }
 0x335   : > { %v789_v47 = vsel %vm733_vm1, %v788_v46, 0.0 }
 0x336   : > { %790 = vadd.xlane.f32.xlu1 %v789_v47 }
 0x347   : > { %917 = vrot.lane.b32.xlu1 %v1769_v49, %s2606_s14 }
 0x394   : > { %v901_v51 = vpop.xlane.xlu1 %900 }
 0x395   : > { %v902_v52 = vsub.f32 %v894_v24, %v901_v51 }
 0x397   : > { %v903_v53 = vpack.c.bf16 %v902_v52, %v902_v52 }
 0x399   : > { %v905_v54 = vmul.bf16 1069105081, %v903_v53 }
 0x39b   : > { %2081 = vpow.bf16 %v905_v54 }
 0x39c   : > { %v1018_v55 = vpop.xlane.xlu0 %1017 }
 0x39d   : > { %v1019_v56 = vsub.f32 %v1011_v30, %v1018_v55 }
 0x39f   : > { %v1020_v57 = vpack.c.bf16 %v1019_v56, %v1019_v56 }
 0x3a1   : > { %v1022_v58 = vmul.bf16 1069105081, %v1020_v57 }
 0x3a3   : > { %2083 = vpow.bf16 %v1022_v58 }
 0x3a4   : > { %v1132_v59 = vpop.xlane.xlu0 %1131 }
 0x3a5   : > { %v1133_v60 = vsub.f32 %v1125_v36, %v1132_v59  ;;  %v1218_v59 = vlaneseq }
 0x3a6   : > { %v2082_v61 = vpop.eup %2081 }
 0x3a7   : > { %v1134_v62 = vpack.c.bf16 %v1133_v60, %v1133_v60  ;;  %v907_v63 = vunpack.c.l.bf16 %v2082_v61  ;;  %v1219_v60 = vshrl.u32 %v1218_v59, 7  ;;  %v1216_v61 = vld [vmem:[#allocation11] sm:$0x1] }
 0x3a9   : > { %v1136_v1 = vmul.bf16 1069105081, %v1134_v62  ;;  %v908_v2 = vsel %vm733_vm1, %v907_v63, 0.0  ;;  %v1217_v62 = vunpack.c.l.bf16 %v1216_v61 }
 0x3aa   : > { %909 = vadd.xlane.f32.xlu0 %v908_v2 }
 0x3ab   : > { %2085 = vpow.bf16 %v1136_v1 }
 0x3ae   : > { %v2084_v3 = vpop.eup %2083 }
 0x3af   : > { %v1024_v4 = vunpack.c.l.bf16 %v2084_v3  ;;  %v1277_v3 = vld [vmem:[%s3171_s3] sm:$0xff] }
 0x3b1   : > { %v1025_v5 = vsel %vm733_vm1, %v1024_v4, 0.0 }
 0x3b2   : > { %1026 = vadd.xlane.f32.xlu1 %v1025_v5 }
 0x3b6   : > { %v2086_v6 = vpop.eup %2085 }
 0x3b7   : > { %v1138_v7 = vunpack.c.l.bf16 %v2086_v6 }
 0x3b9   : > { %v1139_v8 = vsel %vm733_vm1, %v1138_v7, 0.0 }
 0x3ba   : > { %1140 = vadd.xlane.f32.xlu0 %v1139_v8 }
 0x3c3   : > { %v791_v9 = vpop.xlane.xlu1 %790  ;;  %1145 = vrot.lane.b32.xlu1 %v1769_v49, %s2608_s20 }
 0x3c4   : > { %2087 = vrcp.f32 %v791_v9 }
 0x3c7   : > { %v918_v11 = vpop.permute.xlu1 %917 }
 0x3c8   : > { %v923_v14 = vsel %vm798_vm2, %v918_v11, 0 }
 0x3ce   : > { %v2088_v10 = vpop.eup %2087 }
 0x3cf   : > { %v793_v12 = vmul.f32 %v2088_v10, %v788_v46 }
 0x3d0   : > { %1031 = vrot.lane.b32.xlu0 %v1769_v49, %s2607_s17 }
 0x3d1   : > { %v794_v13 = vpack.c.bf16 %v793_v12, %v793_v12 }
 0x3d3   : > { %1828 = vmatmul.mubr.msk.bf16.vlgmr.msra.gmra.mrb[4].mxu0 %vm733_vm1, %v794_v13 }
 0x3d4   : > { %1838 = vmatpush3.bf16.msra.mxu0 %v923_v14  ;;  %1839 = vmatprep.mubr.msk.bf16.mxu0 %vm2605_vm0, %v2604_v0 }
 0x3d5   : > { %1849 = vmatprep.subr.bf16.mxu0 %v2604_v0 }
 0x437   : > { %v910_v15 = vpop.xlane.xlu0 %909 }
 0x438   : > { %2089 = vrcp.f32 %v910_v15  ;;  %v2073_v15 = vld [vmem:[#allocation16] sm:$0xff]  }
 0x43f   : > { %v1027_v16 = vpop.xlane.xlu1 %1026 }
 0x440   : > { %2091 = vrcp.f32 %v1027_v16  ;;  %v2074_v16 = vld [vmem:[#allocation16 + $0x8] sm:$0xff]  }
 0x442   : > { %v2090_v17 = vpop.eup %2089 }
 0x443   : > { %v912_v18 = vmul.f32 %v2090_v17, %v907_v63  ;;  %v1146_v24 = vpop.permute.xlu1 %1145  ;;  %v3252_v63 = vsub.s32 0, %v1219_v60  ;;  %v2075_v17 = vld [vmem:[#allocation19] sm:$0xff]  }
 0x444   : > { %v1151_v27 = vsel %vm798_vm2, %v1146_v24, 0 }
 0x445   : > { %v913_v19 = vpack.c.bf16 %v912_v18, %v912_v18  ;;  %v1221_v1 = vrot.slane %v1217_v62, %v3252_v63  ;;  %v2076_v18 = vld [vmem:[#allocation19 + $0x8] sm:$0xff]  }
 0x447   : > { %1840 = vmatmul.mubr.msk.bf16.vlgmr.msra.gmra.mrb[8].mxu0 %vm733_vm1, %v913_v19  ;;  %v1141_v20 = vpop.xlane.xlu0 %1140 }
 0x448   : > { %2093 = vrcp.f32 %v1141_v20  ;;  %1851 = vmatprep.mubr.msk.bf16.mxu0 %vm2605_vm0, %v2604_v0 }
 0x44a   : > { %v2092_v21 = vpop.eup %2091 }
 0x44b   : > { %v1029_v22 = vmul.f32 %v2092_v21, %v1024_v4  ;;  %v1032_v23 = vpop.permute.xlu0 %1031 }
 0x44c   : > { %v1037_v25 = vsel %vm798_vm2, %v1032_v23, 0 }
 0x44d   : > { %1850 = vmatpush3.bf16.msra.mxu0 %v1037_v25  ;;  %v1030_v26 = vpack.c.bf16 %v1029_v22, %v1029_v22 }
 0x44e   : > { %1861 = vmatprep.subr.bf16.mxu0 %v2604_v0 }
 0x450   : > { %1852 = vmatmul.mubr.msk.bf16.vlgmr.msra.gmra.mrb[12].mxu0 %vm733_vm1, %v1030_v26 }
 0x451   : > { %1862 = vmatpush3.bf16.msra.mxu0 %v1151_v27  ;;  %1863 = vmatprep.mubr.msk.bf16.mxu0 %vm2605_vm0, %v2604_v0 }
 0x452   : > { %v2094_v28 = vpop.eup %2093  ;;  %1875 = vmatprep.subr.bf16.mxu0 %v2604_v0 }
 0x453   : > { %v1143_v29 = vmul.f32 %v2094_v28, %v1138_v7  ;;  %v1778_v28 = vld [vmem:[#allocation13] ss:$0 sm:$0xff] }
 0x455   : > { %v1144_v30 = vpack.c.bf16 %v1143_v29, %v1143_v29 }
 0x458   : > { %1864 = vmatmul.mubr.msk.bf16.vlgmr.msra.gmra.mrb[16].mxu0 %vm733_vm1, %v1144_v30  ;;  %v1779_v30 = vld [vmem:[#allocation14] ss:$0 sm:$0xff] }
 0x459   : > { %1879 = vmatprep.mubr.msk.bf16.mxu0 %vm2605_vm0, %v2604_v0  ;;  %1876 = vmatpush3.bf16.msra.mxu0 %v2073_v15 }
 0x45a   : > { %1877 = vmatprep.subr.bf16.mxu0 %v2604_v0 }
 0x45d   : > { %1878 = vmatpush3.bf16.msra.mxu0 %v2074_v16 }
 0x4a6   : > { %v836_v31 = vpop.f32.mrb[4].mxu0 }
 0x4a7   : > { %v1829_v32 = vpop.f32.mrb[5].mxu0  ;;  %v842_v53 = vpack.c.bf16 %v836_v31, %v836_v31 }
 0x4a8   : > { %v839_v33 = vpop.f32.mrb[6].mxu0 }
 0x4a9   : > { %v1830_v34 = vpop.f32.mrb[7].mxu0 }
 0x4aa   : > { %v2077_v34 = vld [vmem:[#allocation19 + $0x10] sm:$0xff]  }
 0x51a   : > { %v959_v36 = vpop.f32.mrb[8].mxu0 }
 0x51b   : > { %v965_v37 = vpack.c.bf16 %v959_v36, %v959_v36  ;;  %v1841_v38 = vpop.f32.mrb[9].mxu0  ;;  %v1321_v36 = vld [vmem:[#allocation17] sm:$0x1] }
 0x51c   : > { %v962_v40 = vpop.f32.mrb[10].mxu0 }
 0x51d   : > { %1195 = vrot.lane.b32.xlu1 %v965_v37, %s2609_s28  ;;  %v1842_v41 = vpop.f32.mrb[11].mxu0  ;;  %v1322_v37 = vunpack.c.l.bf16 %v1321_v36 }
 0x51f   : > { %v1326_v38 = vrot.slane %v1322_v37, %v3252_v63 }
 0x523   : > { %v1073_v42 = vpop.f32.mrb[12].mxu0 }
 0x524   : > { %v1079_v43 = vpack.c.bf16 %v1073_v42, %v1073_v42  ;;  %v1853_v44 = vpop.f32.mrb[13].mxu0 }
 0x525   : > { %v1076_v45 = vpop.f32.mrb[14].mxu0 }
 0x526   : > { %1198 = vrot.lane.b32.xlu0 %v1079_v43, %s2610_s9  ;;  %v1854_v46 = vpop.f32.mrb[15].mxu0 }
 0x527   : > { %v1392_v46 = vld [vmem:[#allocation20] sm:$0x1] }
 0x52b   : > { %v1187_v47 = vpop.f32.mrb[16].mxu0 }
 0x52c   : > { %v1193_v48 = vpack.c.bf16 %v1187_v47, %v1187_v47  ;;  %v1865_v49 = vpop.f32.mrb[17].mxu0 }
 0x52d   : > { %v1190_v50 = vpop.f32.mrb[18].mxu0 }
 0x52e   : > { %1201 = vrot.lane.b32.xlu1 %v1193_v48, %s2611_s12  ;;  %v1866_v51 = vpop.f32.mrb[19].mxu0 }
 0x58f   : > { %v1196_v52 = vpop.permute.xlu1 %1195 }
 0x590   : > { %v1205_v55 = vsel %vm733_vm1, %v842_v53, %v1196_v52 }
 0x598   : > { %v1199_v54 = vpop.permute.xlu0 %1198 }
 0x599   : > { %v1208_v56 = vsel %vm1206_vm3, %v1205_v55, %v1199_v54 }
 0x5a0   : > { %v1202_v57 = vpop.permute.xlu1 %1201 }
 0x5a1   : > { %v1211_v58 = vsel %vm1209_vm4, %v1208_v56, %v1202_v57 }
 0x5a2   : > { %1872 = vmatmul.mubr.msk.bf16.vlgmr.msra.gmra.mrb[12].mxu1 %vm1234_vm5, %v1211_v58 }
 0x5a3   : > { %1891 = vmatprep.mubr.msk.bf16.mxu1 %vm2605_vm0, %v2604_v0  ;;  %1884 = vmatpush3.bf16.msra.mxu1 %v2075_v17 }
 0x5a4   : > { %1885 = vmatprep.subr.bf16.mxu1 %v2604_v0 }
 0x5a7   : > { %1886 = vmatpush3.bf16.msra.mxu1 %v2076_v18 }
 0x5a8   : > { %1887 = vmatprep.subr.bf16.mxu1 %v2604_v0 }
 0x5ab   : > { %1888 = vmatpush3.bf16.msra.mxu1 %v2077_v34 }
 0x5ac   : > { %1889 = vmatprep.subr.bf16.mxu1 %v2604_v0  ;;  %v1393_v0 = vunpack.c.l.bf16 %v1392_v46 }
 0x5ae   : > { %v1397_v47 = vrot.slane %v1393_v0, %v3252_v63 }
 0x5af   : > { %1890 = vmatpush3.bf16.msra.mxu1 %v2078_v35 }
 0x675   : > { %v1271_v2 = vpop.f32.mrb[12].mxu1 }
 0x676   : > { %v1272_v4 = vadd.f32 %v1271_v2, %v1221_v1  ;;  %v1873_v5 = vpop.f32.mrb[13].mxu1 }
 0x677   : > { %v1274_v6 = vpop.f32.mrb[14].mxu1 }
 0x678   : > { %v3256_v7 = vadd.f32 %v1277_v3, %v1272_v4  ;;  %v1874_v8 = vpop.f32.mrb[15].mxu1 }
 0x67a   : > { %v1281_v9 = vsel %vm1234_vm5, %v3256_v7, 0.0 }
 0x67b   : > { %1282 = vadd.xlane.f32.xlu0 %v1281_v9 }
 0x708   : > { %v1283_v10 = vpop.xlane.xlu0 %1282 }
 0x709   : > { %v1285_v11 = vmul.f32 0.03125, %v1283_v10 }
 0x70b   : > { %v1286_v12 = vsub.f32 %v3256_v7, %v1285_v11 }
 0x70d   : > { %v1287_v13 = vmul.f32 %v1286_v12, %v1286_v12 }
 0x70f   : > { %v1288_v14 = vsel %vm1234_vm5, %v1287_v13, 0.0 }
 0x710   : > { %1289 = vadd.xlane.f32.xlu1 %v1288_v14 }
 0x79d   : > { %v1290_v19 = vpop.xlane.xlu1 %1289 }
 0x79e   : > { %v1291_v20 = vmul.f32 0.032258064, %v1290_v19 }
 0x7a0   : > { %2095 = vrsqrt.f32 %v1291_v20  ;;  %vm1294_vm6 = vcmp.eq.f32.partialorder %v1291_v20, inf  ;;  %v1297_v23 = vand.u32 2147483648, %v1291_v20  ;;  %vm1296_vm7 = vcmp.eq.f32.partialorder %v1291_v20, 0.0 }
 0x7aa   : > { %v2096_v21 = vpop.eup %2095 }
 0x7ab   : > { %v1293_v22 = vmul.f32 %v2096_v21, %v1291_v20 }
 0x7ad   : > { %v1295_v24 = vsel %vm1294_vm6, %v1291_v20, %v1293_v22 }
 0x7ae   : > { %v1298_v25 = vsel %vm1296_vm7, %v1297_v23, %v1295_v24 }
 0x7af   : > { %v1299_v26 = vadd.f32 1e-06, %v1298_v25 }
 0x7b1   : > { %2097 = vrcp.f32 %v1299_v26 }
 0x7bb   : > { %v2098_v27 = vpop.eup %2097 }
 0x7bc   : > { %v1301_v29 = vmul.f32 %v2098_v27, %v1286_v12 }
 0x7be   : > { %v1308_v31 = vmul.f32 %v1778_v28, %v1301_v29 }
 0x7c0   : > { %v1315_v32 = vadd.f32 %v1779_v30, %v1308_v31 }
 0x7c2   : > { %v1316_v33 = vpack.c.bf16 %v1315_v32, %v1315_v32 }
 0x7c4   : > { %1880 = vmatmul.mubr.msk.bf16.vlgmr.msra.gmra.mrb[20].mxu0 %vm1234_vm5, %v1316_v33 }
 0x897   : > { %v1376_v39 = vpop.f32.mrb[20].mxu0 }
 0x898   : > { %v1377_v40 = vadd.f32 %v1376_v39, %v1326_v38  ;;  %v1881_v41 = vpop.f32.mrb[21].mxu0 }
 0x899   : > { %v1379_v42 = vpop.f32.mrb[22].mxu0 }
 0x89a   : > { %v1382_v43 = vmax.f32 %v1377_v40, 0.0  ;;  %v1882_v44 = vpop.f32.mrb[23].mxu0 }
 0x89c   : > { %v1383_v45 = vpack.c.bf16 %v1382_v43, %v1382_v43 }
 0x89e   : > { %1892 = vmatmul.mubr.msk.bf16.vlgmr.msra.gmra.mrb[16].mxu1 %vm1422_vm8, %v1383_v45 }
 0x971   : > { %v1460_v48 = vpop.f32.mrb[16].mxu1 }
 0x972   : > { %v1461_v49 = vadd.f32 %v1460_v48, %v1397_v47  ;;  %v1893_v50 = vpop.f32.mrb[17].mxu1 }
 0x973   : > { %v1463_v51 = vpop.f32.mrb[18].mxu1 }
 0x974   : > { %v1466_v52 = vadd.f32 %v1461_v49, %v3256_v7  ;;  %v1894_v53 = vpop.f32.mrb[19].mxu1 }
 0x976   : > { %1467 = vst.msk [vmem:[%s726_s25] sm:$0xff] %vm1234_vm5, %v1466_v52 }
 0x977   : > { %2486 = shalt.err (!%p2483_p3)
}
 0x978   : > { %s2487_s1 = scalar_lea.hbm %s3276_s2, 128  ;;  %s2491_s17 = scalar_lea.hbm %s3439_s13, 256 }
 0x979   : > { %p2488_p5 = scmp.ne.s32.totalorder %s3276_s2, %s2487_s1  ;;  %p2492_p4 = scmp.lt.u32.totalorder %s3276_s2, %s3439_s13 }
 0x97a   : > { %p2493_p2 = scmp.lt.u32.totalorder %s2491_s17, %s2487_s1  ;;  %p2495_p9 = scmp.lt.u32.totalorder %s2487_s1, %s3276_s2 }
 0x97b   : > { %p2489_p12 = pnand %p2488_p5, %p3440_p10 }
 0x97c   : > { %p2494_p6 = por %p2493_p2, %p2492_p4 }
 0x97d   : > { %p2490_p7 = pneg %p2489_p12 }
 0x97e   : > { %p2496_p8 = por %p2495_p9, %p2494_p6 }
 0x980   : > { %p2497_p1 = pnand %p2496_p8, %p2490_p7 }
 0x982   : > { %2500 = shalt.err (!%p2497_p1)
}
 0x983   : > { %1937 = dma.vmem_to_hbm [thread:$0]  (%p3440_p10), %s3278_s19, 128, %s3276_s2, %s1469_s11  }
 0x984 PF: > { %s3441_s9 = sld [smem:[#allocation34_spill]]  ;;  %s3442_s12 = sld [smem:[#allocation41_spill]] }
 0x985   : > { %s3443_s22 = sld [smem:[#allocation36_spill]] }
 0x98a   : > { %s1495_s0 = sand.u32 1, %s3441_s9   ;;  %p3444_p11 = scmp.ne.s32.totalorder %s3442_s12, 0 }
 0x98b   : > { %p3445_p0 = scmp.ge.s32.totalorder %s3443_s22, 2  ;;  %s1496_s25 = scalar_lea.sflag [#allocation4], %s1495_s0 }
 0x98d   : > { %p1981_p13 = pnand %p3445_p0, %p3444_p11 }
 0x98f   : > { %2562 = dma.done.wait (!%p1981_p13), %s1496_s25, 128  }
 0x990   : > { %2564 = vsyncadd (!%p1981_p13), %s1496_s25, 4294967168  ;;  %s39_s30 = sadd.s32 1, %s3443_s22   ;;  %s3446_s7 = sld [smem:[#allocation40_spill]] }
 0x991   : > { %p36_p3 = scmp.ge.s32.totalorder %s39_s30, 4   ;;  %s3447_s5 = sld [smem:[#allocation38_spill]] }
 0x992   : > { %s3448_s25 = smov %s2571_s26  ;;  %s3449_s26 = smov %s2575_s27 }
 0x993   : > { %s3451_s28 = smov %s2583_s29  ;;  %38 = sbr.rel (!%p36_p3) target bundleno = 27 (0x1b), region = 197 }
 0x996   : > { %s3450_s27 = smov %s3446_s7 }
 0x997   : > { %s3452_s29 = smov %s3447_s5 }
 0x99a   :  { %1501 = vsyncpa [#allocation3], 1 }
 0x99b   :  { %1503 = vsyncpa [#allocation3 + $0x1], 1 }
 0x99c   :  { %1504 = vsyncpa [#allocation6], 1 }
 0x99d   :  { %1506 = vsyncpa [#allocation6 + $0x1], 1 }
 0x99e   :  { %1507 = vsyncpa [#allocation9], 1 }
 0x99f   :  { %1509 = vsyncpa [#allocation9 + $0x1], 1 }
 0x9a0   :  { %1510 = vsyncpa [#allocation12], 1 }
 0x9a1   :  { %1511 = vsyncpa [#allocation15], 1 }
 0x9a2   :  { %1512 = vsyncpa [#allocation18], 1 }
 0x9a3   :  { %1513 = vsyncpa [#allocation21], 1 }
 0x9a4   :  { %1514 = vsyncpa [#allocation4], 1 }
 0x9a5   :  { %1516 = vsyncpa [#allocation4 + $0x1], 1 }

</bundles_post_ra>
